<compile_context>
chip_gen: v7x
topology: tpu7x:2x2x1
jax: 0.10.0
libtpu: 0.0.40
codegen_flags: <defaults>
</compile_context>

<pallas_src>
import math
from functools import lru_cache, partial

import jax
import jax.numpy as jnp
from jax.experimental import pallas as pl
from jax.experimental.pallas import tpu as pltpu


# ------------------------------ configuration ------------------------------

@lru_cache(maxsize=None)
def _device_cfg():
    """Per-generation defaults: sequence tile size and scoped-VMEM budget."""
    try:
        kind = jax.devices()[0].device_kind.lower()
    except Exception:  # pragma: no cover
        kind = ""
    if "v5 lite" in kind or "v5e" in kind:
        return {"seq_tile": 128, "vmem": 32 * 1024 * 1024}
    if "v6" in kind:
        return {"seq_tile": 256, "vmem": 64 * 1024 * 1024}
    # v7x (64 MiB physical VMEM per TC) and anything unknown: stay <= 48 MiB.
    return {"seq_tile": 256, "vmem": 48 * 1024 * 1024}


def _compiler_params(dim_sem):
    return pltpu.CompilerParams(dimension_semantics=dim_sem,
                                vmem_limit_bytes=_device_cfg()["vmem"])


def _pick_head_group(num_heads, cols_per_head, d_in, budget=8 << 20):
    """Largest head group whose (d_in, hg*cols_per_head) bf16 weight block fits
    `budget` while staying lane-aligned (multiple of 128 lanes or full width)."""
    full_cols = num_heads * cols_per_head
    smallest_ok = num_heads
    for hg in range(num_heads, 0, -1):
        if num_heads % hg:
            continue
        cols = hg * cols_per_head
        if cols % 128 != 0 and cols != full_cols:
            continue
        smallest_ok = hg
        if d_in * cols * 2 <= budget:
            return hg
    return smallest_ok


def _row_tile(M, pref):
    """Row tile that divides M (full M if nothing suitable)."""
    if M <= pref:
        return M
    for t in range(pref, 7, -1):
        if M % t == 0 and t % 8 == 0:
            return t
    return M


# ---------------------------- projection kernels ----------------------------

def _make_q_proj_kernel(heads_per_block, head_dim, scale):
    def kernel(x_ref, w_ref, b_ref, o_ref):
        x = x_ref[0].astype(jnp.bfloat16)                       # (ts, D)
        y = jnp.dot(x, w_ref[...], preferred_element_type=jnp.float32)
        y = (y + b_ref[...]) * scale                            # f32 epilogue; scale folded here
        for h in range(heads_per_block):                        # in-VMEM head split
            o_ref[0, h] = y[:, h * head_dim:(h + 1) * head_dim].astype(o_ref.dtype)
    return kernel


def _make_kv_proj_kernel(heads_per_block, head_dim):
    two_hd = 2 * head_dim

    def kernel(x_ref, w_ref, b_ref, k_ref, v_ref):
        x = x_ref[0].astype(jnp.bfloat16)                       # (ts, D)
        y = jnp.dot(x, w_ref[...], preferred_element_type=jnp.float32)
        y = y + b_ref[...]
        for h in range(heads_per_block):                        # chunk(k,v) per head, in VMEM
            base = h * two_hd
            k_ref[0, h] = y[:, base:base + head_dim].astype(k_ref.dtype)
            v_ref[0, h] = y[:, base + head_dim:base + two_hd].astype(v_ref.dtype)
    return kernel


def q_head_projection(y, w, b, num_heads, *, seq_tile, scale):
    """(B,S,D) @ (D,D) + b, scaled by 1/sqrt(hd), written as (B,H,S,hd) bf16."""
    B, S, D = y.shape
    hd = D // num_heads
    hg = _pick_head_group(num_heads, hd, D)
    grid = (B, S // seq_tile, num_heads // hg)
    return pl.pallas_call(
        _make_q_proj_kernel(hg, hd, scale),
        out_shape=jax.ShapeDtypeStruct((B, num_heads, S, hd), jnp.bfloat16),
        grid=grid,
        in_specs=[
            pl.BlockSpec((1, seq_tile, D), lambda b, s, g: (b, s, 0)),
            pl.BlockSpec((D, hg * hd), lambda b, s, g: (0, g)),
            pl.BlockSpec((1, hg * hd), lambda b, s, g: (0, g)),
        ],
        out_specs=pl.BlockSpec((1, hg, seq_tile, hd), lambda b, s, g: (b, g, s, 0)),
        compiler_params=_compiler_params(("parallel", "parallel", "arbitrary")),
    )(y, w, b.reshape(1, D))


def kv_head_projection(x, w, b, num_heads, *, seq_tile):
    """Fused k/v projection using the module's interleaved kv weight layout
    [h0:(k,v), h1:(k,v), ...] unchanged.  Outputs two (B,H,S,hd) bf16 tensors
    directly (no HBM transpose / chunk passes)."""
    B, S, D = x.shape
    hd = D // num_heads
    hg = _pick_head_group(num_heads, 2 * hd, D)
    grid = (B, S // seq_tile, num_heads // hg)
    out = jax.ShapeDtypeStruct((B, num_heads, S, hd), jnp.bfloat16)
    head_spec = pl.BlockSpec((1, hg, seq_tile, hd), lambda b, s, g: (b, g, s, 0))
    return pl.pallas_call(
        _make_kv_proj_kernel(hg, hd),
        out_shape=(out, out),
        grid=grid,
        in_specs=[
            pl.BlockSpec((1, seq_tile, D), lambda b, s, g: (b, s, 0)),
            pl.BlockSpec((D, hg * 2 * hd), lambda b, s, g: (0, g)),
            pl.BlockSpec((1, hg * 2 * hd), lambda b, s, g: (0, g)),
        ],
        out_specs=(head_spec, head_spec),
        compiler_params=_compiler_params(("parallel", "parallel", "arbitrary")),
    )(x, w, b.reshape(1, 2 * D))


# ------------------------------ output linear -------------------------------

def _linear_kernel(x_ref, w_ref, b_ref, o_ref):
    x = x_ref[...].astype(jnp.bfloat16)
    acc = jnp.dot(x, w_ref[...], preferred_element_type=jnp.float32)
    o_ref[...] = (acc + b_ref[...]).astype(o_ref.dtype)


def output_linear(x2d, w, b, *, row_tile):
    """y = x2d @ w + b, M-tiled with resident bf16 weight, f32 output.
    # TODO(synk): add N/K-axis weight tiling (f32 VMEM accumulator) for very
    # large d_model so the resident weight fits v7x's 64 MiB VMEM."""
    M, D = x2d.shape
    N = w.shape[1]
    tm = _row_tile(M, row_tile)
    return pl.pallas_call(
        _linear_kernel,
        out_shape=jax.ShapeDtypeStruct((M, N), jnp.float32),
        grid=(M // tm,),
        in_specs=[
            pl.BlockSpec((tm, D), lambda i: (i, 0)),
            pl.BlockSpec((D, N), lambda i: (0, 0)),   # resident weight
            pl.BlockSpec((1, N), lambda i: (0, 0)),   # resident bias
        ],
        out_specs=pl.BlockSpec((tm, N), lambda i: (i, 0)),
        compiler_params=_compiler_params(("parallel",)),
    )(x2d, w, b.reshape(1, N))


# ------------------------------ attention kernel ----------------------------

def _make_attn_kernel(with_mask, kv_tail, kv_len, tk):
    """Flash-style online-softmax attention over all heads of one batch."""

    def kernel(*refs):
        if with_mask:
            q_ref, k_ref, v_ref, msk_ref, o_ref, m_sc, l_sc, acc_sc = refs
        else:
            q_ref, k_ref, v_ref, o_ref, m_sc, l_sc, acc_sc = refs

        ki = pl.program_id(2)

        @pl.when(ki == 0)
        def _init():
            m_sc[...] = jnp.full(m_sc.shape, -jnp.inf, m_sc.dtype)
            l_sc[...] = jnp.zeros(l_sc.shape, l_sc.dtype)
            acc_sc[...] = jnp.zeros(acc_sc.shape, acc_sc.dtype)

        q = q_ref[0]                                   # (H, tq, hd) bf16, pre-scaled
        k = k_ref[0]                                   # (H, tk, hd) bf16
        v = v_ref[0]                                   # (H, tk, hd) bf16

        # Batched over heads; contraction on last dims (no explicit transpose).
        s = jnp.einsum("hqd,hkd->hqk", q, k,
                       preferred_element_type=jnp.float32)     # (H, tq, tk) f32
        if with_mask:
            s = s + msk_ref[0, 0].astype(jnp.float32)          # (tq, tk) bcast over H
        if kv_tail:
            col = ki * tk + jax.lax.broadcasted_iota(jnp.int32, (1, 1, tk), 2)
            s = jnp.where(col < kv_len, s, jnp.float32(-1e30))

        m_new = jnp.maximum(m_sc[...], jnp.max(s, axis=-1, keepdims=True))
        alpha = jnp.exp(m_sc[...] - m_new)
        p = jnp.exp(s - m_new)
        l_sc[...] = alpha * l_sc[...] + jnp.sum(p, axis=-1, keepdims=True)
        acc_sc[...] = alpha * acc_sc[...] + jnp.einsum(
            "hqk,hkd->hqd", p.astype(v.dtype), v,
            preferred_element_type=jnp.float32)
        m_sc[...] = m_new

        @pl.when(ki == pl.num_programs(2) - 1)
        def _finalize():
            o_ref[0] = (acc_sc[...] *
                        pl.reciprocal(l_sc[...], approx=True)).astype(o_ref.dtype)

    return kernel


def mha_attention(q, k, v, mask, *, kv_len, tq, tk):
    """q, k, v: (B, H, Sp, hd) bf16 (q pre-scaled).  mask: None or (1,1,Sp,Sp) bf16.
    Returns (B, H, Sp, hd) bf16; kv columns >= kv_len are masked in-kernel."""
    B, H, Sp, hd = q.shape
    kv_tail = kv_len != Sp
    grid = (B, Sp // tq, Sp // tk)

    q_spec = pl.BlockSpec((1, H, tq, hd), lambda b, qi, ki: (b, 0, qi, 0))
    kv_spec = pl.BlockSpec((1, H, tk, hd), lambda b, qi, ki: (b, 0, ki, 0))
    # TODO(synk): sweep pipeline_mode=pl.Buffered(3) on kv_spec for long S on v6e.
    out_spec = pl.BlockSpec((1, H, tq, hd), lambda b, qi, ki: (b, 0, qi, 0))

    scratch = [pltpu.VMEM((H, tq, 1), jnp.float32),   # running max
               pltpu.VMEM((H, tq, 1), jnp.float32),   # running denom
               pltpu.VMEM((H, tq, hd), jnp.float32)]  # running numerator

    if mask is None:
        in_specs = [q_spec, kv_spec, kv_spec]
        args = (q, k, v)
    else:
        mask_spec = pl.BlockSpec((1, 1, tq, tk), lambda b, qi, ki: (0, 0, qi, ki))
        in_specs = [q_spec, kv_spec, kv_spec, mask_spec]
        args = (q, k, v, mask)

    return pl.pallas_call(
        _make_attn_kernel(mask is not None, kv_tail, kv_len, tk),
        out_shape=jax.ShapeDtypeStruct((B, H, Sp, hd), jnp.bfloat16),
        grid=grid,
        in_specs=in_specs,
        out_specs=out_spec,
        scratch_shapes=scratch,
        compiler_params=_compiler_params(("parallel", "parallel", "arbitrary")),
    )(*args)


# --------------------------- module forward pass ---------------------------

def init_params(key, d_model):
    # Deterministic init mimicking nn.Linear default: U(-1/sqrt(fan_in), ...)
    ks = jax.random.split(key, 6)
    bound = 1.0 / math.sqrt(d_model)

    def u(k, shape):
        return jax.random.uniform(k, shape, jnp.float32, -bound, bound)

    return {
        "kv_w": u(ks[0], (d_model, 2 * d_model)),
        "kv_b": u(ks[1], (2 * d_model,)),
        "q_w": u(ks[2], (d_model, d_model)),
        "q_b": u(ks[3], (d_model,)),
        "o_w": u(ks[4], (d_model, d_model)),
        "o_b": u(ks[5], (d_model,)),
    }


def prepare_params(params):
    """One-time (outside jit) dtype prep: bf16 weights for the MXU, f32 biases."""
    bf = jnp.bfloat16
    return {
        "kv_w": params["kv_w"].astype(bf),
        "kv_b": params["kv_b"].astype(jnp.float32),
        "q_w": params["q_w"].astype(bf),
        "q_b": params["q_b"].astype(jnp.float32),
        "o_w": params["o_w"].astype(bf),
        "o_b": params["o_b"].astype(jnp.float32),
    }


@partial(jax.jit, static_argnames=("num_heads",))
def multi_head_cross_attention(x, y, params, num_heads, mask=None):
    B, S, D = x.shape
    hd = D // num_heads
    tile = _device_cfg()["seq_tile"]

    # Pad the sequence once so every kernel tiles at 128/256; padded KV columns
    # are masked in-kernel, padded Q rows are dropped at the end.
    if S <= tile:
        Sp, seq_t = S, S
    else:
        Sp = int(pl.cdiv(S, tile)) * tile
        seq_t = tile
    if Sp != S:
        pad = ((0, 0), (0, Sp - S), (0, 0))
        x = jnp.pad(x, pad)
        y = jnp.pad(y, pad)

    # Projections written directly in (B, H, Sp, hd) bf16 layout; the 1/sqrt(hd)
    # attention scale is folded into the q projection's f32 epilogue.
    k, v = kv_head_projection(x, params["kv_w"], params["kv_b"], num_heads,
                              seq_tile=seq_t)
    q = q_head_projection(y, params["q_w"], params["q_b"], num_heads,
                          seq_tile=seq_t, scale=1.0 / math.sqrt(hd))

    msk = None
    if mask is not None:
        # Shared additive mask, deduplicated across (B, H); clamp -inf to a
        # finite floor so fully-masked rows cannot NaN the online softmax.
        msk = jnp.maximum(jnp.asarray(mask, jnp.float32).reshape(S, S), -1e30)
        if Sp != S:
            msk = jnp.pad(msk, ((0, Sp - S), (0, Sp - S)))
        msk = msk.astype(jnp.bfloat16).reshape(1, 1, Sp, Sp)

    values = mha_attention(q, k, v, msk, kv_len=S, tq=seq_t, tk=seq_t)  # bf16
    if Sp != S:
        values = values[:, :, :S, :]

    # NOTE: the PyTorch module reshapes (B,H,S,hd) -> (B,S,H*hd) directly (no
    # permute back); the row-major reshape below reproduces exactly that and is
    # a free bitcast feeding the output linear.
    out = output_linear(values.reshape(B * S, D), params["o_w"], params["o_b"],
                        row_tile=tile)
    return out.reshape(B, S, D)


# ------------------------------- reference ---------------------------------

def reference(x, y, params, num_heads, mask=None):
    B, S, D = x.shape
    hd = D // num_heads
    kv = x.reshape(B * S, D) @ params["kv_w"] + params["kv_b"]
    q = y.reshape(B * S, D) @ params["q_w"] + params["q_b"]
    kv = kv.reshape(B, S, num_heads, 2 * hd).transpose(0, 2, 1, 3)
    q = q.reshape(B, S, num_heads, hd).transpose(0, 2, 1, 3)
    k, v = jnp.split(kv, 2, axis=-1)
    scaled = jnp.einsum("bhqd,bhkd->bhqk", q, k) / math.sqrt(hd)
    if mask is not None:
        scaled = scaled + jnp.asarray(mask, jnp.float32).reshape(1, 1, S, S)
    attn = jax.nn.softmax(scaled, axis=-1)
    vals = jnp.einsum("bhqk,bhkd->bhqd", attn, v)
    vals = vals.reshape(B, S, num_heads * hd)
    out = vals.reshape(B * S, D) @ params["o_w"] + params["o_b"]
    return out.reshape(B, S, D)


# --------------------------------- main -------------------------------------

if __name__ == "__main__":
    B, S, d_model, num_heads = 2, 8, 32, 8

    key = jax.random.PRNGKey(0)
    kx, ky, kp = jax.random.split(key, 3)
    x = jax.random.normal(kx, (B, S, d_model), jnp.float32)
    y = jax.random.normal(ky, (B, S, d_model), jnp.float32)
    params = init_params(kp, d_model)
    prepared = prepare_params(params)

    # ---- mask=None path: mask-free kernel variant (no zero mask in HBM) ----
    out = multi_head_cross_attention(x, y, prepared, num_heads, mask=None)
    out = jax.block_until_ready(out)
    ref = reference(x, y, params, num_heads, mask=None)
    assert out.shape == (B, S, d_model)
    err = float(jnp.max(jnp.abs(out - ref)))
    assert jnp.allclose(out, ref, atol=3e-2, rtol=3e-2), err   # bf16 weights/activations

    # ---- masked path: shared (1,1,S,S) additive mask, dedup across (B,H) ----
    causal = jnp.where(jnp.arange(S)[:, None] >= jnp.arange(S)[None, :],
                       0.0, -1e9).astype(jnp.float32)
    out_m = multi_head_cross_attention(x, y, prepared, num_heads, mask=causal)
    out_m = jax.block_until_ready(out_m)
    ref_m = reference(x, y, params, num_heads, mask=causal)
    err_m = float(jnp.max(jnp.abs(out_m - ref_m)))
    assert jnp.allclose(out_m, ref_m, atol=3e-2, rtol=3e-2), err_m

    print("KERNEL_OK")
</pallas_src>

<mosaic_0001>
module attributes {stable_mosaic.version = 11 : i64} {
  func.func @kernel(%arg0: i32, %arg1: i32, %arg2: i32, %arg3: memref<1x8x8x4xbf16, #tpu.memory_space<vmem>>, %arg4: memref<1x8x8x4xbf16, #tpu.memory_space<vmem>>, %arg5: memref<1x8x8x4xbf16, #tpu.memory_space<vmem>>, %arg6: memref<1x8x8x4xbf16, #tpu.memory_space<vmem>>, %arg7: memref<8x8x1xf32, #tpu.memory_space<vmem>>, %arg8: memref<8x8x1xf32, #tpu.memory_space<vmem>>, %arg9: memref<8x8x4xf32, #tpu.memory_space<vmem>>) attributes {dimension_semantics = [#tpu.dimension_semantics<parallel>, #tpu.dimension_semantics<parallel>, #tpu.dimension_semantics<arbitrary>], iteration_bounds = array<i64: 2, 1, 1>, scalar_prefetch = 0 : i64, scratch_operands = 3 : i64, tpu.core_type = #tpu.core_type<tc>, window_params = [{transform_indices = @transform_0, window_bounds = array<i64: 1, 8, 8, 4>}, {transform_indices = @transform_1, window_bounds = array<i64: 1, 8, 8, 4>}, {transform_indices = @transform_2, window_bounds = array<i64: 1, 8, 8, 4>}, {transform_indices = @transform_3, window_bounds = array<i64: 1, 8, 8, 4>}]} {
    %c0_i32 = arith.constant 0 : i32
    %0 = arith.cmpi eq, %arg2, %c0_i32 : i32
    %1 = arith.extui %0 : i1 to i32
    %c0_i32_0 = arith.constant 0 : i32
    %2 = arith.cmpi ne, %1, %c0_i32_0 : i32
    scf.if %2 {
      %cst_38 = arith.constant 0xFF800000 : f32
      %37 = vector.broadcast %cst_38 : f32 to vector<8x8x1xf32>
      %c0_39 = arith.constant 0 : index
      %c0_40 = arith.constant 0 : index
      %c0_41 = arith.constant 0 : index
      %38 = vector.load %arg7[%c0_39, %c0_40, %c0_41] : memref<8x8x1xf32, #tpu.memory_space<vmem>>, vector<8x8x1xf32>
      tpu.vector_store %arg7[%c0_39, %c0_40, %c0_41], %37 {strides = array<i32>} : memref<8x8x1xf32, #tpu.memory_space<vmem>>, vector<8x8x1xf32>,
      %cst_42 = arith.constant 0.000000e+00 : f32
      %39 = vector.broadcast %cst_42 : f32 to vector<8x8x1xf32>
      %c0_43 = arith.constant 0 : index
      %c0_44 = arith.constant 0 : index
      %c0_45 = arith.constant 0 : index
      %40 = vector.load %arg8[%c0_43, %c0_44, %c0_45] : memref<8x8x1xf32, #tpu.memory_space<vmem>>, vector<8x8x1xf32>
      tpu.vector_store %arg8[%c0_43, %c0_44, %c0_45], %39 {strides = array<i32>} : memref<8x8x1xf32, #tpu.memory_space<vmem>>, vector<8x8x1xf32>,
      %cst_46 = arith.constant 0.000000e+00 : f32
      %41 = vector.broadcast %cst_46 : f32 to vector<8x8x4xf32>
      %c0_47 = arith.constant 0 : index
      %c0_48 = arith.constant 0 : index
      %c0_49 = arith.constant 0 : index
      %42 = vector.load %arg9[%c0_47, %c0_48, %c0_49] : memref<8x8x4xf32, #tpu.memory_space<vmem>>, vector<8x8x4xf32>
      tpu.vector_store %arg9[%c0_47, %c0_48, %c0_49], %41 {strides = array<i32>} : memref<8x8x4xf32, #tpu.memory_space<vmem>>, vector<8x8x4xf32>,
    } else {
    }
    %c0 = arith.constant 0 : index
    %c0_1 = arith.constant 0 : index
    %c0_2 = arith.constant 0 : index
    %c0_3 = arith.constant 0 : index
    %3 = vector.load %arg3[%c0, %c0_1, %c0_2, %c0_3] : memref<1x8x8x4xbf16, #tpu.memory_space<vmem>>, vector<1x8x8x4xbf16>
    %4 = vector.shape_cast %3 : vector<1x8x8x4xbf16> to vector<8x8x4xbf16>
    %c0_4 = arith.constant 0 : index
    %c0_5 = arith.constant 0 : index
    %c0_6 = arith.constant 0 : index
    %c0_7 = arith.constant 0 : index
    %5 = vector.load %arg4[%c0_4, %c0_5, %c0_6, %c0_7] : memref<1x8x8x4xbf16, #tpu.memory_space<vmem>>, vector<1x8x8x4xbf16>
    %6 = vector.shape_cast %5 : vector<1x8x8x4xbf16> to vector<8x8x4xbf16>
    %c0_8 = arith.constant 0 : index
    %c0_9 = arith.constant 0 : index
    %c0_10 = arith.constant 0 : index
    %c0_11 = arith.constant 0 : index
    %7 = vector.load %arg5[%c0_8, %c0_9, %c0_10, %c0_11] : memref<1x8x8x4xbf16, #tpu.memory_space<vmem>>, vector<1x8x8x4xbf16>
    %8 = vector.shape_cast %7 : vector<1x8x8x4xbf16> to vector<8x8x4xbf16>
    "tpu.trace_start"() <{level = 10 : i32, message = "hqd,hkd->hqk"}> : () -> ()
    %cst = arith.constant dense<0.000000e+00> : vector<8x8x8xf32>
    %9 = tpu.matmul %4, %6, %cst {dimension_numbers = #tpu.dot_dimension_numbers<[2], [2], [1], [1], [0, 0, 0, 1, 1, 1], [0], [0]>} : vector<8x8x4xbf16>, vector<8x8x4xbf16>, vector<8x8x8xf32> -> vector<8x8x8xf32>
    "tpu.trace_stop"() : () -> ()
    %c0_12 = arith.constant 0 : index
    %c0_13 = arith.constant 0 : index
    %c0_14 = arith.constant 0 : index
    %10 = vector.load %arg7[%c0_12, %c0_13, %c0_14] : memref<8x8x1xf32, #tpu.memory_space<vmem>>, vector<8x8x1xf32>
    %cst_15 = arith.constant dense<0xFF800000> : vector<8x8xf32>
    %11 = vector.multi_reduction <maximumf>, %9, %cst_15 [2] : vector<8x8x8xf32> to vector<8x8xf32>
    %12 = vector.shape_cast %11 : vector<8x8xf32> to vector<8x8x1xf32>
    %13 = arith.maximumf %10, %12 : vector<8x8x1xf32>
    %c0_16 = arith.constant 0 : index
    %c0_17 = arith.constant 0 : index
    %c0_18 = arith.constant 0 : index
    %14 = vector.load %arg7[%c0_16, %c0_17, %c0_18] : memref<8x8x1xf32, #tpu.memory_space<vmem>>, vector<8x8x1xf32>
    %15 = arith.subf %14, %13 : vector<8x8x1xf32>
    %16 = math.exp %15 : vector<8x8x1xf32>
    %17 = vector.broadcast %13 : vector<8x8x1xf32> to vector<8x8x8xf32>
    %18 = arith.subf %9, %17 : vector<8x8x8xf32>
    %19 = math.exp %18 : vector<8x8x8xf32>
    %c0_19 = arith.constant 0 : index
    %c0_20 = arith.constant 0 : index
    %c0_21 = arith.constant 0 : index
    %20 = vector.load %arg8[%c0_19, %c0_20, %c0_21] : memref<8x8x1xf32, #tpu.memory_space<vmem>>, vector<8x8x1xf32>
    %21 = arith.mulf %16, %20 : vector<8x8x1xf32>
    %cst_22 = arith.constant dense<0.000000e+00> : vector<8x8xf32>
    %22 = vector.multi_reduction <add>, %19, %cst_22 [2] : vector<8x8x8xf32> to vector<8x8xf32>
    %23 = vector.shape_cast %22 : vector<8x8xf32> to vector<8x8x1xf32>
    %24 = arith.addf %21, %23 : vector<8x8x1xf32>
    %c0_23 = arith.constant 0 : index
    %c0_24 = arith.constant 0 : index
    %c0_25 = arith.constant 0 : index
    %25 = vector.load %arg8[%c0_23, %c0_24, %c0_25] : memref<8x8x1xf32, #tpu.memory_space<vmem>>, vector<8x8x1xf32>
    tpu.vector_store %arg8[%c0_23, %c0_24, %c0_25], %24 {strides = array<i32>} : memref<8x8x1xf32, #tpu.memory_space<vmem>>, vector<8x8x1xf32>,
    %c0_26 = arith.constant 0 : index
    %c0_27 = arith.constant 0 : index
    %c0_28 = arith.constant 0 : index
    %26 = vector.load %arg9[%c0_26, %c0_27, %c0_28] : memref<8x8x4xf32, #tpu.memory_space<vmem>>, vector<8x8x4xf32>
    %27 = vector.broadcast %16 : vector<8x8x1xf32> to vector<8x8x4xf32>
    %28 = arith.mulf %27, %26 : vector<8x8x4xf32>
    %29 = arith.truncf %19 : vector<8x8x8xf32> to vector<8x8x8xbf16>
    "tpu.trace_start"() <{level = 10 : i32, message = "hqk,hkd->hqd"}> : () -> ()
    %cst_29 = arith.constant dense<0.000000e+00> : vector<8x8x4xf32>
    %30 = tpu.matmul %29, %8, %cst_29 {dimension_numbers = #tpu.dot_dimension_numbers<[2], [1], [1], [2], [0, 0, 0, 1, 1, 2], [0], [0]>} : vector<8x8x8xbf16>, vector<8x8x4xbf16>, vector<8x8x4xf32> -> vector<8x8x4xf32>
    "tpu.trace_stop"() : () -> ()
    %31 = arith.addf %28, %30 : vector<8x8x4xf32>
    %c0_30 = arith.constant 0 : index
    %c0_31 = arith.constant 0 : index
    %c0_32 = arith.constant 0 : index
    %32 = vector.load %arg9[%c0_30, %c0_31, %c0_32] : memref<8x8x4xf32, #tpu.memory_space<vmem>>, vector<8x8x4xf32>
    tpu.vector_store %arg9[%c0_30, %c0_31, %c0_32], %31 {strides = array<i32>} : memref<8x8x4xf32, #tpu.memory_space<vmem>>, vector<8x8x4xf32>,
    %c0_33 = arith.constant 0 : index
    %c0_34 = arith.constant 0 : index
    %c0_35 = arith.constant 0 : index
    %33 = vector.load %arg7[%c0_33, %c0_34, %c0_35] : memref<8x8x1xf32, #tpu.memory_space<vmem>>, vector<8x8x1xf32>
    tpu.vector_store %arg7[%c0_33, %c0_34, %c0_35], %13 {strides = array<i32>} : memref<8x8x1xf32, #tpu.memory_space<vmem>>, vector<8x8x1xf32>,
    %c0_i32_36 = arith.constant 0 : i32
    %34 = arith.cmpi eq, %arg2, %c0_i32_36 : i32
    %35 = arith.extui %34 : i1 to i32
    %c0_i32_37 = arith.constant 0 : i32
    %36 = arith.cmpi ne, %35, %c0_i32_37 : i32
    scf.if %36 {
      %c0_38 = arith.constant 0 : index
      %c0_39 = arith.constant 0 : index
      %c0_40 = arith.constant 0 : index
      %37 = vector.load %arg9[%c0_38, %c0_39, %c0_40] : memref<8x8x4xf32, #tpu.memory_space<vmem>>, vector<8x8x4xf32>
      %c0_41 = arith.constant 0 : index
      %c0_42 = arith.constant 0 : index
      %c0_43 = arith.constant 0 : index
      %38 = vector.load %arg8[%c0_41, %c0_42, %c0_43] : memref<8x8x1xf32, #tpu.memory_space<vmem>>, vector<8x8x1xf32>
      %39 = tpu.reciprocal %38 {approx = true} : vector<8x8x1xf32> -> vector<8x8x1xf32>
      %40 = vector.broadcast %39 : vector<8x8x1xf32> to vector<8x8x4xf32>
      %41 = arith.mulf %37, %40 : vector<8x8x4xf32>
      %42 = arith.truncf %41 : vector<8x8x4xf32> to vector<8x8x4xbf16>
      %c0_44 = arith.constant 0 : index
      %c0_45 = arith.constant 0 : index
      %c0_46 = arith.constant 0 : index
      %c0_47 = arith.constant 0 : index
      %43 = vector.load %arg6[%c0_44, %c0_45, %c0_46, %c0_47] : memref<1x8x8x4xbf16, #tpu.memory_space<vmem>>, vector<1x8x8x4xbf16>
      %44 = vector.shape_cast %43 : vector<1x8x8x4xbf16> to vector<8x8x4xbf16>
      %45 = vector.shape_cast %42 : vector<8x8x4xbf16> to vector<1x8x8x4xbf16>
      tpu.vector_store %arg6[%c0_44, %c0_45, %c0_46, %c0_47], %45 {strides = array<i32>} : memref<1x8x8x4xbf16, #tpu.memory_space<vmem>>, vector<1x8x8x4xbf16>,
    } else {
    }
    return
  }
  func.func @transform_0(%arg0: i32, %arg1: i32, %arg2: i32) -> (i32, i32, i32, i32) {
    %c0_i32 = arith.constant 0 : i32
    %c0_i32_0 = arith.constant 0 : i32
    %c0_i32_1 = arith.constant 0 : i32
    return %arg0, %c0_i32, %arg1, %c0_i32_0 : i32, i32, i32, i32
  }
  func.func @transform_1(%arg0: i32, %arg1: i32, %arg2: i32) -> (i32, i32, i32, i32) {
    %c0_i32 = arith.constant 0 : i32
    %c0_i32_0 = arith.constant 0 : i32
    %c0_i32_1 = arith.constant 0 : i32
    return %arg0, %c0_i32, %arg2, %c0_i32_0 : i32, i32, i32, i32
  }
  func.func @transform_2(%arg0: i32, %arg1: i32, %arg2: i32) -> (i32, i32, i32, i32) {
    %c0_i32 = arith.constant 0 : i32
    %c0_i32_0 = arith.constant 0 : i32
    %c0_i32_1 = arith.constant 0 : i32
    return %arg0, %c0_i32, %arg2, %c0_i32_0 : i32, i32, i32, i32
  }
  func.func @transform_3(%arg0: i32, %arg1: i32, %arg2: i32) -> (i32, i32, i32, i32) {
    %c0_i32 = arith.constant 0 : i32
    %c0_i32_0 = arith.constant 0 : i32
    %c0_i32_1 = arith.constant 0 : i32
    return %arg0, %c0_i32, %arg1, %c0_i32_0 : i32, i32, i32, i32
  }
}

module attributes {stable_mosaic.version = 11 : i64} {
  func.func @kernel(%arg0: i32, %arg1: i32, %arg2: i32, %arg3: memref<1x8x32xf32, #tpu.memory_space<vmem>>, %arg4: memref<32x64xbf16, #tpu.memory_space<vmem>>, %arg5: memref<1x64xf32, #tpu.memory_space<vmem>>, %arg6: memref<1x8x8x4xbf16, #tpu.memory_space<vmem>>, %arg7: memref<1x8x8x4xbf16, #tpu.memory_space<vmem>>) attributes {dimension_semantics = [#tpu.dimension_semantics<parallel>, #tpu.dimension_semantics<parallel>, #tpu.dimension_semantics<arbitrary>], iteration_bounds = array<i64: 2, 1, 1>, scalar_prefetch = 0 : i64, scratch_operands = 0 : i64, tpu.core_type = #tpu.core_type<tc>, window_params = [{transform_indices = @transform_0, window_bounds = array<i64: 1, 8, 32>}, {transform_indices = @transform_1, window_bounds = array<i64: 32, 64>}, {transform_indices = @transform_2, window_bounds = array<i64: 1, 64>}, {transform_indices = @transform_3, window_bounds = array<i64: 1, 8, 8, 4>}, {transform_indices = @transform_4, window_bounds = array<i64: 1, 8, 8, 4>}]} {
    %c0 = arith.constant 0 : index
    %c0_0 = arith.constant 0 : index
    %c0_1 = arith.constant 0 : index
    %0 = vector.load %arg3[%c0, %c0_0, %c0_1] : memref<1x8x32xf32, #tpu.memory_space<vmem>>, vector<1x8x32xf32>
    %1 = vector.shape_cast %0 : vector<1x8x32xf32> to vector<8x32xf32>
    %2 = arith.truncf %1 : vector<8x32xf32> to vector<8x32xbf16>
    %c0_2 = arith.constant 0 : index
    %c0_3 = arith.constant 0 : index
    %3 = vector.load %arg4[%c0_2, %c0_3] : memref<32x64xbf16, #tpu.memory_space<vmem>>, vector<32x64xbf16>
    %cst = arith.constant dense<0.000000e+00> : vector<8x64xf32>
    %4 = tpu.matmul %2, %3, %cst {dimension_numbers = #tpu.dot_dimension_numbers<[1], [0], [0], [1], [0, 0, 1, 1], [], []>} : vector<8x32xbf16>, vector<32x64xbf16>, vector<8x64xf32> -> vector<8x64xf32>
    %c0_4 = arith.constant 0 : index
    %c0_5 = arith.constant 0 : index
    %5 = vector.load %arg5[%c0_4, %c0_5] : memref<1x64xf32, #tpu.memory_space<vmem>>, vector<1x64xf32>
    %6 = vector.broadcast %5 : vector<1x64xf32> to vector<8x64xf32>
    %7 = arith.addf %4, %6 : vector<8x64xf32>
    %8 = vector.extract_strided_slice %7 {offsets = [0, 0], sizes = [8, 4], strides = [1, 1]} : vector<8x64xf32> to vector<8x4xf32>
    %9 = arith.truncf %8 : vector<8x4xf32> to vector<8x4xbf16>
    %c0_6 = arith.constant 0 : index
    %c0_7 = arith.constant 0 : index
    %c0_8 = arith.constant 0 : index
    %c0_9 = arith.constant 0 : index
    %10 = vector.load %arg6[%c0_6, %c0_7, %c0_8, %c0_9] : memref<1x8x8x4xbf16, #tpu.memory_space<vmem>>, vector<1x1x8x4xbf16>
    %11 = vector.shape_cast %10 : vector<1x1x8x4xbf16> to vector<8x4xbf16>
    %12 = vector.shape_cast %9 : vector<8x4xbf16> to vector<1x1x8x4xbf16>
    tpu.vector_store %arg6[%c0_6, %c0_7, %c0_8, %c0_9], %12 {strides = array<i32>} : memref<1x8x8x4xbf16, #tpu.memory_space<vmem>>, vector<1x1x8x4xbf16>,
    %13 = vector.extract_strided_slice %7 {offsets = [0, 4], sizes = [8, 4], strides = [1, 1]} : vector<8x64xf32> to vector<8x4xf32>
    %14 = arith.truncf %13 : vector<8x4xf32> to vector<8x4xbf16>
    %c0_10 = arith.constant 0 : index
    %c0_11 = arith.constant 0 : index
    %c0_12 = arith.constant 0 : index
    %c0_13 = arith.constant 0 : index
    %15 = vector.load %arg7[%c0_10, %c0_11, %c0_12, %c0_13] : memref<1x8x8x4xbf16, #tpu.memory_space<vmem>>, vector<1x1x8x4xbf16>
    %16 = vector.shape_cast %15 : vector<1x1x8x4xbf16> to vector<8x4xbf16>
    %17 = vector.shape_cast %14 : vector<8x4xbf16> to vector<1x1x8x4xbf16>
    tpu.vector_store %arg7[%c0_10, %c0_11, %c0_12, %c0_13], %17 {strides = array<i32>} : memref<1x8x8x4xbf16, #tpu.memory_space<vmem>>, vector<1x1x8x4xbf16>,
    %18 = vector.extract_strided_slice %7 {offsets = [0, 8], sizes = [8, 4], strides = [1, 1]} : vector<8x64xf32> to vector<8x4xf32>
    %19 = arith.truncf %18 : vector<8x4xf32> to vector<8x4xbf16>
    %c0_14 = arith.constant 0 : index
    %c1 = arith.constant 1 : index
    %c0_15 = arith.constant 0 : index
    %c0_16 = arith.constant 0 : index
    %20 = vector.load %arg6[%c0_14, %c1, %c0_15, %c0_16] : memref<1x8x8x4xbf16, #tpu.memory_space<vmem>>, vector<1x1x8x4xbf16>
    %21 = vector.shape_cast %20 : vector<1x1x8x4xbf16> to vector<8x4xbf16>
    %22 = vector.shape_cast %19 : vector<8x4xbf16> to vector<1x1x8x4xbf16>
    tpu.vector_store %arg6[%c0_14, %c1, %c0_15, %c0_16], %22 {strides = array<i32>} : memref<1x8x8x4xbf16, #tpu.memory_space<vmem>>, vector<1x1x8x4xbf16>,
    %23 = vector.extract_strided_slice %7 {offsets = [0, 12], sizes = [8, 4], strides = [1, 1]} : vector<8x64xf32> to vector<8x4xf32>
    %24 = arith.truncf %23 : vector<8x4xf32> to vector<8x4xbf16>
    %c0_17 = arith.constant 0 : index
    %c1_18 = arith.constant 1 : index
    %c0_19 = arith.constant 0 : index
    %c0_20 = arith.constant 0 : index
    %25 = vector.load %arg7[%c0_17, %c1_18, %c0_19, %c0_20] : memref<1x8x8x4xbf16, #tpu.memory_space<vmem>>, vector<1x1x8x4xbf16>
    %26 = vector.shape_cast %25 : vector<1x1x8x4xbf16> to vector<8x4xbf16>
    %27 = vector.shape_cast %24 : vector<8x4xbf16> to vector<1x1x8x4xbf16>
    tpu.vector_store %arg7[%c0_17, %c1_18, %c0_19, %c0_20], %27 {strides = array<i32>} : memref<1x8x8x4xbf16, #tpu.memory_space<vmem>>, vector<1x1x8x4xbf16>,
    %28 = vector.extract_strided_slice %7 {offsets = [0, 16], sizes = [8, 4], strides = [1, 1]} : vector<8x64xf32> to vector<8x4xf32>
    %29 = arith.truncf %28 : vector<8x4xf32> to vector<8x4xbf16>
    %c0_21 = arith.constant 0 : index
    %c2 = arith.constant 2 : index
    %c0_22 = arith.constant 0 : index
    %c0_23 = arith.constant 0 : index
    %30 = vector.load %arg6[%c0_21, %c2, %c0_22, %c0_23] : memref<1x8x8x4xbf16, #tpu.memory_space<vmem>>, vector<1x1x8x4xbf16>
    %31 = vector.shape_cast %30 : vector<1x1x8x4xbf16> to vector<8x4xbf16>
    %32 = vector.shape_cast %29 : vector<8x4xbf16> to vector<1x1x8x4xbf16>
    tpu.vector_store %arg6[%c0_21, %c2, %c0_22, %c0_23], %32 {strides = array<i32>} : memref<1x8x8x4xbf16, #tpu.memory_space<vmem>>, vector<1x1x8x4xbf16>,
    %33 = vector.extract_strided_slice %7 {offsets = [0, 20], sizes = [8, 4], strides = [1, 1]} : vector<8x64xf32> to vector<8x4xf32>
    %34 = arith.truncf %33 : vector<8x4xf32> to vector<8x4xbf16>
    %c0_24 = arith.constant 0 : index
    %c2_25 = arith.constant 2 : index
    %c0_26 = arith.constant 0 : index
    %c0_27 = arith.constant 0 : index
    %35 = vector.load %arg7[%c0_24, %c2_25, %c0_26, %c0_27] : memref<1x8x8x4xbf16, #tpu.memory_space<vmem>>, vector<1x1x8x4xbf16>
    %36 = vector.shape_cast %35 : vector<1x1x8x4xbf16> to vector<8x4xbf16>
    %37 = vector.shape_cast %34 : vector<8x4xbf16> to vector<1x1x8x4xbf16>
    tpu.vector_store %arg7[%c0_24, %c2_25, %c0_26, %c0_27], %37 {strides = array<i32>} : memref<1x8x8x4xbf16, #tpu.memory_space<vmem>>, vector<1x1x8x4xbf16>,
    %38 = vector.extract_strided_slice %7 {offsets = [0, 24], sizes = [8, 4], strides = [1, 1]} : vector<8x64xf32> to vector<8x4xf32>
    %39 = arith.truncf %38 : vector<8x4xf32> to vector<8x4xbf16>
    %c0_28 = arith.constant 0 : index
    %c3 = arith.constant 3 : index
    %c0_29 = arith.constant 0 : index
    %c0_30 = arith.constant 0 : index
    %40 = vector.load %arg6[%c0_28, %c3, %c0_29, %c0_30] : memref<1x8x8x4xbf16, #tpu.memory_space<vmem>>, vector<1x1x8x4xbf16>
    %41 = vector.shape_cast %40 : vector<1x1x8x4xbf16> to vector<8x4xbf16>
    %42 = vector.shape_cast %39 : vector<8x4xbf16> to vector<1x1x8x4xbf16>
    tpu.vector_store %arg6[%c0_28, %c3, %c0_29, %c0_30], %42 {strides = array<i32>} : memref<1x8x8x4xbf16, #tpu.memory_space<vmem>>, vector<1x1x8x4xbf16>,
    %43 = vector.extract_strided_slice %7 {offsets = [0, 28], sizes = [8, 4], strides = [1, 1]} : vector<8x64xf32> to vector<8x4xf32>
    %44 = arith.truncf %43 : vector<8x4xf32> to vector<8x4xbf16>
    %c0_31 = arith.constant 0 : index
    %c3_32 = arith.constant 3 : index
    %c0_33 = arith.constant 0 : index
    %c0_34 = arith.constant 0 : index
    %45 = vector.load %arg7[%c0_31, %c3_32, %c0_33, %c0_34] : memref<1x8x8x4xbf16, #tpu.memory_space<vmem>>, vector<1x1x8x4xbf16>
    %46 = vector.shape_cast %45 : vector<1x1x8x4xbf16> to vector<8x4xbf16>
    %47 = vector.shape_cast %44 : vector<8x4xbf16> to vector<1x1x8x4xbf16>
    tpu.vector_store %arg7[%c0_31, %c3_32, %c0_33, %c0_34], %47 {strides = array<i32>} : memref<1x8x8x4xbf16, #tpu.memory_space<vmem>>, vector<1x1x8x4xbf16>,
    %48 = vector.extract_strided_slice %7 {offsets = [0, 32], sizes = [8, 4], strides = [1, 1]} : vector<8x64xf32> to vector<8x4xf32>
    %49 = arith.truncf %48 : vector<8x4xf32> to vector<8x4xbf16>
    %c0_35 = arith.constant 0 : index
    %c4 = arith.constant 4 : index
    %c0_36 = arith.constant 0 : index
    %c0_37 = arith.constant 0 : index
    %50 = vector.load %arg6[%c0_35, %c4, %c0_36, %c0_37] : memref<1x8x8x4xbf16, #tpu.memory_space<vmem>>, vector<1x1x8x4xbf16>
    %51 = vector.shape_cast %50 : vector<1x1x8x4xbf16> to vector<8x4xbf16>
    %52 = vector.shape_cast %49 : vector<8x4xbf16> to vector<1x1x8x4xbf16>
    tpu.vector_store %arg6[%c0_35, %c4, %c0_36, %c0_37], %52 {strides = array<i32>} : memref<1x8x8x4xbf16, #tpu.memory_space<vmem>>, vector<1x1x8x4xbf16>,
    %53 = vector.extract_strided_slice %7 {offsets = [0, 36], sizes = [8, 4], strides = [1, 1]} : vector<8x64xf32> to vector<8x4xf32>
    %54 = arith.truncf %53 : vector<8x4xf32> to vector<8x4xbf16>
    %c0_38 = arith.constant 0 : index
    %c4_39 = arith.constant 4 : index
    %c0_40 = arith.constant 0 : index
    %c0_41 = arith.constant 0 : index
    %55 = vector.load %arg7[%c0_38, %c4_39, %c0_40, %c0_41] : memref<1x8x8x4xbf16, #tpu.memory_space<vmem>>, vector<1x1x8x4xbf16>
    %56 = vector.shape_cast %55 : vector<1x1x8x4xbf16> to vector<8x4xbf16>
    %57 = vector.shape_cast %54 : vector<8x4xbf16> to vector<1x1x8x4xbf16>
    tpu.vector_store %arg7[%c0_38, %c4_39, %c0_40, %c0_41], %57 {strides = array<i32>} : memref<1x8x8x4xbf16, #tpu.memory_space<vmem>>, vector<1x1x8x4xbf16>,
    %58 = vector.extract_strided_slice %7 {offsets = [0, 40], sizes = [8, 4], strides = [1, 1]} : vector<8x64xf32> to vector<8x4xf32>
    %59 = arith.truncf %58 : vector<8x4xf32> to vector<8x4xbf16>
    %c0_42 = arith.constant 0 : index
    %c5 = arith.constant 5 : index
    %c0_43 = arith.constant 0 : index
    %c0_44 = arith.constant 0 : index
    %60 = vector.load %arg6[%c0_42, %c5, %c0_43, %c0_44] : memref<1x8x8x4xbf16, #tpu.memory_space<vmem>>, vector<1x1x8x4xbf16>
    %61 = vector.shape_cast %60 : vector<1x1x8x4xbf16> to vector<8x4xbf16>
    %62 = vector.shape_cast %59 : vector<8x4xbf16> to vector<1x1x8x4xbf16>
    tpu.vector_store %arg6[%c0_42, %c5, %c0_43, %c0_44], %62 {strides = array<i32>} : memref<1x8x8x4xbf16, #tpu.memory_space<vmem>>, vector<1x1x8x4xbf16>,
    %63 = vector.extract_strided_slice %7 {offsets = [0, 44], sizes = [8, 4], strides = [1, 1]} : vector<8x64xf32> to vector<8x4xf32>
    %64 = arith.truncf %63 : vector<8x4xf32> to vector<8x4xbf16>
    %c0_45 = arith.constant 0 : index
    %c5_46 = arith.constant 5 : index
    %c0_47 = arith.constant 0 : index
    %c0_48 = arith.constant 0 : index
    %65 = vector.load %arg7[%c0_45, %c5_46, %c0_47, %c0_48] : memref<1x8x8x4xbf16, #tpu.memory_space<vmem>>, vector<1x1x8x4xbf16>
    %66 = vector.shape_cast %65 : vector<1x1x8x4xbf16> to vector<8x4xbf16>
    %67 = vector.shape_cast %64 : vector<8x4xbf16> to vector<1x1x8x4xbf16>
    tpu.vector_store %arg7[%c0_45, %c5_46, %c0_47, %c0_48], %67 {strides = array<i32>} : memref<1x8x8x4xbf16, #tpu.memory_space<vmem>>, vector<1x1x8x4xbf16>,
    %68 = vector.extract_strided_slice %7 {offsets = [0, 48], sizes = [8, 4], strides = [1, 1]} : vector<8x64xf32> to vector<8x4xf32>
    %69 = arith.truncf %68 : vector<8x4xf32> to vector<8x4xbf16>
    %c0_49 = arith.constant 0 : index
    %c6 = arith.constant 6 : index
    %c0_50 = arith.constant 0 : index
    %c0_51 = arith.constant 0 : index
    %70 = vector.load %arg6[%c0_49, %c6, %c0_50, %c0_51] : memref<1x8x8x4xbf16, #tpu.memory_space<vmem>>, vector<1x1x8x4xbf16>
    %71 = vector.shape_cast %70 : vector<1x1x8x4xbf16> to vector<8x4xbf16>
    %72 = vector.shape_cast %69 : vector<8x4xbf16> to vector<1x1x8x4xbf16>
    tpu.vector_store %arg6[%c0_49, %c6, %c0_50, %c0_51], %72 {strides = array<i32>} : memref<1x8x8x4xbf16, #tpu.memory_space<vmem>>, vector<1x1x8x4xbf16>,
    %73 = vector.extract_strided_slice %7 {offsets = [0, 52], sizes = [8, 4], strides = [1, 1]} : vector<8x64xf32> to vector<8x4xf32>
    %74 = arith.truncf %73 : vector<8x4xf32> to vector<8x4xbf16>
    %c0_52 = arith.constant 0 : index
    %c6_53 = arith.constant 6 : index
    %c0_54 = arith.constant 0 : index
    %c0_55 = arith.constant 0 : index
    %75 = vector.load %arg7[%c0_52, %c6_53, %c0_54, %c0_55] : memref<1x8x8x4xbf16, #tpu.memory_space<vmem>>, vector<1x1x8x4xbf16>
    %76 = vector.shape_cast %75 : vector<1x1x8x4xbf16> to vector<8x4xbf16>
    %77 = vector.shape_cast %74 : vector<8x4xbf16> to vector<1x1x8x4xbf16>
    tpu.vector_store %arg7[%c0_52, %c6_53, %c0_54, %c0_55], %77 {strides = array<i32>} : memref<1x8x8x4xbf16, #tpu.memory_space<vmem>>, vector<1x1x8x4xbf16>,
    %78 = vector.extract_strided_slice %7 {offsets = [0, 56], sizes = [8, 4], strides = [1, 1]} : vector<8x64xf32> to vector<8x4xf32>
    %79 = arith.truncf %78 : vector<8x4xf32> to vector<8x4xbf16>
    %c0_56 = arith.constant 0 : index
    %c7 = arith.constant 7 : index
    %c0_57 = arith.constant 0 : index
    %c0_58 = arith.constant 0 : index
    %80 = vector.load %arg6[%c0_56, %c7, %c0_57, %c0_58] : memref<1x8x8x4xbf16, #tpu.memory_space<vmem>>, vector<1x1x8x4xbf16>
    %81 = vector.shape_cast %80 : vector<1x1x8x4xbf16> to vector<8x4xbf16>
    %82 = vector.shape_cast %79 : vector<8x4xbf16> to vector<1x1x8x4xbf16>
    tpu.vector_store %arg6[%c0_56, %c7, %c0_57, %c0_58], %82 {strides = array<i32>} : memref<1x8x8x4xbf16, #tpu.memory_space<vmem>>, vector<1x1x8x4xbf16>,
    %83 = vector.extract_strided_slice %7 {offsets = [0, 60], sizes = [8, 4], strides = [1, 1]} : vector<8x64xf32> to vector<8x4xf32>
    %84 = arith.truncf %83 : vector<8x4xf32> to vector<8x4xbf16>
    %c0_59 = arith.constant 0 : index
    %c7_60 = arith.constant 7 : index
    %c0_61 = arith.constant 0 : index
    %c0_62 = arith.constant 0 : index
    %85 = vector.load %arg7[%c0_59, %c7_60, %c0_61, %c0_62] : memref<1x8x8x4xbf16, #tpu.memory_space<vmem>>, vector<1x1x8x4xbf16>
    %86 = vector.shape_cast %85 : vector<1x1x8x4xbf16> to vector<8x4xbf16>
    %87 = vector.shape_cast %84 : vector<8x4xbf16> to vector<1x1x8x4xbf16>
    tpu.vector_store %arg7[%c0_59, %c7_60, %c0_61, %c0_62], %87 {strides = array<i32>} : memref<1x8x8x4xbf16, #tpu.memory_space<vmem>>, vector<1x1x8x4xbf16>,
    return
  }
  func.func @transform_0(%arg0: i32, %arg1: i32, %arg2: i32) -> (i32, i32, i32) {
    %c0_i32 = arith.constant 0 : i32
    %c0_i32_0 = arith.constant 0 : i32
    return %arg0, %arg1, %c0_i32 : i32, i32, i32
  }
  func.func @transform_1(%arg0: i32, %arg1: i32, %arg2: i32) -> (i32, i32) {
    %c0_i32 = arith.constant 0 : i32
    %c0_i32_0 = arith.constant 0 : i32
    return %c0_i32, %arg2 : i32, i32
  }
  func.func @transform_2(%arg0: i32, %arg1: i32, %arg2: i32) -> (i32, i32) {
    %c0_i32 = arith.constant 0 : i32
    %c0_i32_0 = arith.constant 0 : i32
    return %c0_i32, %arg2 : i32, i32
  }
  func.func @transform_3(%arg0: i32, %arg1: i32, %arg2: i32) -> (i32, i32, i32, i32) {
    %c0_i32 = arith.constant 0 : i32
    %c0_i32_0 = arith.constant 0 : i32
    return %arg0, %arg2, %arg1, %c0_i32 : i32, i32, i32, i32
  }
  func.func @transform_4(%arg0: i32, %arg1: i32, %arg2: i32) -> (i32, i32, i32, i32) {
    %c0_i32 = arith.constant 0 : i32
    %c0_i32_0 = arith.constant 0 : i32
    return %arg0, %arg2, %arg1, %c0_i32 : i32, i32, i32, i32
  }
}

module attributes {stable_mosaic.version = 11 : i64} {
  func.func @kernel(%arg0: i32, %arg1: i32, %arg2: i32, %arg3: memref<1x8x32xf32, #tpu.memory_space<vmem>>, %arg4: memref<32x32xbf16, #tpu.memory_space<vmem>>, %arg5: memref<1x32xf32, #tpu.memory_space<vmem>>, %arg6: memref<1x8x8x4xbf16, #tpu.memory_space<vmem>>) attributes {dimension_semantics = [#tpu.dimension_semantics<parallel>, #tpu.dimension_semantics<parallel>, #tpu.dimension_semantics<arbitrary>], iteration_bounds = array<i64: 2, 1, 1>, scalar_prefetch = 0 : i64, scratch_operands = 0 : i64, tpu.core_type = #tpu.core_type<tc>, window_params = [{transform_indices = @transform_0, window_bounds = array<i64: 1, 8, 32>}, {transform_indices = @transform_1, window_bounds = array<i64: 32, 32>}, {transform_indices = @transform_2, window_bounds = array<i64: 1, 32>}, {transform_indices = @transform_3, window_bounds = array<i64: 1, 8, 8, 4>}]} {
    %c0 = arith.constant 0 : index
    %c0_0 = arith.constant 0 : index
    %c0_1 = arith.constant 0 : index
    %0 = vector.load %arg3[%c0, %c0_0, %c0_1] : memref<1x8x32xf32, #tpu.memory_space<vmem>>, vector<1x8x32xf32>
    %1 = vector.shape_cast %0 : vector<1x8x32xf32> to vector<8x32xf32>
    %2 = arith.truncf %1 : vector<8x32xf32> to vector<8x32xbf16>
    %c0_2 = arith.constant 0 : index
    %c0_3 = arith.constant 0 : index
    %3 = vector.load %arg4[%c0_2, %c0_3] : memref<32x32xbf16, #tpu.memory_space<vmem>>, vector<32x32xbf16>
    %cst = arith.constant dense<0.000000e+00> : vector<8x32xf32>
    %4 = tpu.matmul %2, %3, %cst {dimension_numbers = #tpu.dot_dimension_numbers<[1], [0], [0], [1], [0, 0, 1, 1], [], []>} : vector<8x32xbf16>, vector<32x32xbf16>, vector<8x32xf32> -> vector<8x32xf32>
    %c0_4 = arith.constant 0 : index
    %c0_5 = arith.constant 0 : index
    %5 = vector.load %arg5[%c0_4, %c0_5] : memref<1x32xf32, #tpu.memory_space<vmem>>, vector<1x32xf32>
    %6 = vector.broadcast %5 : vector<1x32xf32> to vector<8x32xf32>
    %7 = arith.addf %4, %6 : vector<8x32xf32>
    %cst_6 = arith.constant 5.000000e-01 : f32
    %8 = vector.broadcast %cst_6 : f32 to vector<8x32xf32>
    %9 = arith.mulf %7, %8 : vector<8x32xf32>
    %10 = vector.extract_strided_slice %9 {offsets = [0, 0], sizes = [8, 4], strides = [1, 1]} : vector<8x32xf32> to vector<8x4xf32>
    %11 = arith.truncf %10 : vector<8x4xf32> to vector<8x4xbf16>
    %c0_7 = arith.constant 0 : index
    %c0_8 = arith.constant 0 : index
    %c0_9 = arith.constant 0 : index
    %c0_10 = arith.constant 0 : index
    %12 = vector.load %arg6[%c0_7, %c0_8, %c0_9, %c0_10] : memref<1x8x8x4xbf16, #tpu.memory_space<vmem>>, vector<1x1x8x4xbf16>
    %13 = vector.shape_cast %12 : vector<1x1x8x4xbf16> to vector<8x4xbf16>
    %14 = vector.shape_cast %11 : vector<8x4xbf16> to vector<1x1x8x4xbf16>
    tpu.vector_store %arg6[%c0_7, %c0_8, %c0_9, %c0_10], %14 {strides = array<i32>} : memref<1x8x8x4xbf16, #tpu.memory_space<vmem>>, vector<1x1x8x4xbf16>,
    %15 = vector.extract_strided_slice %9 {offsets = [0, 4], sizes = [8, 4], strides = [1, 1]} : vector<8x32xf32> to vector<8x4xf32>
    %16 = arith.truncf %15 : vector<8x4xf32> to vector<8x4xbf16>
    %c0_11 = arith.constant 0 : index
    %c1 = arith.constant 1 : index
    %c0_12 = arith.constant 0 : index
    %c0_13 = arith.constant 0 : index
    %17 = vector.load %arg6[%c0_11, %c1, %c0_12, %c0_13] : memref<1x8x8x4xbf16, #tpu.memory_space<vmem>>, vector<1x1x8x4xbf16>
    %18 = vector.shape_cast %17 : vector<1x1x8x4xbf16> to vector<8x4xbf16>
    %19 = vector.shape_cast %16 : vector<8x4xbf16> to vector<1x1x8x4xbf16>
    tpu.vector_store %arg6[%c0_11, %c1, %c0_12, %c0_13], %19 {strides = array<i32>} : memref<1x8x8x4xbf16, #tpu.memory_space<vmem>>, vector<1x1x8x4xbf16>,
    %20 = vector.extract_strided_slice %9 {offsets = [0, 8], sizes = [8, 4], strides = [1, 1]} : vector<8x32xf32> to vector<8x4xf32>
    %21 = arith.truncf %20 : vector<8x4xf32> to vector<8x4xbf16>
    %c0_14 = arith.constant 0 : index
    %c2 = arith.constant 2 : index
    %c0_15 = arith.constant 0 : index
    %c0_16 = arith.constant 0 : index
    %22 = vector.load %arg6[%c0_14, %c2, %c0_15, %c0_16] : memref<1x8x8x4xbf16, #tpu.memory_space<vmem>>, vector<1x1x8x4xbf16>
    %23 = vector.shape_cast %22 : vector<1x1x8x4xbf16> to vector<8x4xbf16>
    %24 = vector.shape_cast %21 : vector<8x4xbf16> to vector<1x1x8x4xbf16>
    tpu.vector_store %arg6[%c0_14, %c2, %c0_15, %c0_16], %24 {strides = array<i32>} : memref<1x8x8x4xbf16, #tpu.memory_space<vmem>>, vector<1x1x8x4xbf16>,
    %25 = vector.extract_strided_slice %9 {offsets = [0, 12], sizes = [8, 4], strides = [1, 1]} : vector<8x32xf32> to vector<8x4xf32>
    %26 = arith.truncf %25 : vector<8x4xf32> to vector<8x4xbf16>
    %c0_17 = arith.constant 0 : index
    %c3 = arith.constant 3 : index
    %c0_18 = arith.constant 0 : index
    %c0_19 = arith.constant 0 : index
    %27 = vector.load %arg6[%c0_17, %c3, %c0_18, %c0_19] : memref<1x8x8x4xbf16, #tpu.memory_space<vmem>>, vector<1x1x8x4xbf16>
    %28 = vector.shape_cast %27 : vector<1x1x8x4xbf16> to vector<8x4xbf16>
    %29 = vector.shape_cast %26 : vector<8x4xbf16> to vector<1x1x8x4xbf16>
    tpu.vector_store %arg6[%c0_17, %c3, %c0_18, %c0_19], %29 {strides = array<i32>} : memref<1x8x8x4xbf16, #tpu.memory_space<vmem>>, vector<1x1x8x4xbf16>,
    %30 = vector.extract_strided_slice %9 {offsets = [0, 16], sizes = [8, 4], strides = [1, 1]} : vector<8x32xf32> to vector<8x4xf32>
    %31 = arith.truncf %30 : vector<8x4xf32> to vector<8x4xbf16>
    %c0_20 = arith.constant 0 : index
    %c4 = arith.constant 4 : index
    %c0_21 = arith.constant 0 : index
    %c0_22 = arith.constant 0 : index
    %32 = vector.load %arg6[%c0_20, %c4, %c0_21, %c0_22] : memref<1x8x8x4xbf16, #tpu.memory_space<vmem>>, vector<1x1x8x4xbf16>
    %33 = vector.shape_cast %32 : vector<1x1x8x4xbf16> to vector<8x4xbf16>
    %34 = vector.shape_cast %31 : vector<8x4xbf16> to vector<1x1x8x4xbf16>
    tpu.vector_store %arg6[%c0_20, %c4, %c0_21, %c0_22], %34 {strides = array<i32>} : memref<1x8x8x4xbf16, #tpu.memory_space<vmem>>, vector<1x1x8x4xbf16>,
    %35 = vector.extract_strided_slice %9 {offsets = [0, 20], sizes = [8, 4], strides = [1, 1]} : vector<8x32xf32> to vector<8x4xf32>
    %36 = arith.truncf %35 : vector<8x4xf32> to vector<8x4xbf16>
    %c0_23 = arith.constant 0 : index
    %c5 = arith.constant 5 : index
    %c0_24 = arith.constant 0 : index
    %c0_25 = arith.constant 0 : index
    %37 = vector.load %arg6[%c0_23, %c5, %c0_24, %c0_25] : memref<1x8x8x4xbf16, #tpu.memory_space<vmem>>, vector<1x1x8x4xbf16>
    %38 = vector.shape_cast %37 : vector<1x1x8x4xbf16> to vector<8x4xbf16>
    %39 = vector.shape_cast %36 : vector<8x4xbf16> to vector<1x1x8x4xbf16>
    tpu.vector_store %arg6[%c0_23, %c5, %c0_24, %c0_25], %39 {strides = array<i32>} : memref<1x8x8x4xbf16, #tpu.memory_space<vmem>>, vector<1x1x8x4xbf16>,
    %40 = vector.extract_strided_slice %9 {offsets = [0, 24], sizes = [8, 4], strides = [1, 1]} : vector<8x32xf32> to vector<8x4xf32>
    %41 = arith.truncf %40 : vector<8x4xf32> to vector<8x4xbf16>
    %c0_26 = arith.constant 0 : index
    %c6 = arith.constant 6 : index
    %c0_27 = arith.constant 0 : index
    %c0_28 = arith.constant 0 : index
    %42 = vector.load %arg6[%c0_26, %c6, %c0_27, %c0_28] : memref<1x8x8x4xbf16, #tpu.memory_space<vmem>>, vector<1x1x8x4xbf16>
    %43 = vector.shape_cast %42 : vector<1x1x8x4xbf16> to vector<8x4xbf16>
    %44 = vector.shape_cast %41 : vector<8x4xbf16> to vector<1x1x8x4xbf16>
    tpu.vector_store %arg6[%c0_26, %c6, %c0_27, %c0_28], %44 {strides = array<i32>} : memref<1x8x8x4xbf16, #tpu.memory_space<vmem>>, vector<1x1x8x4xbf16>,
    %45 = vector.extract_strided_slice %9 {offsets = [0, 28], sizes = [8, 4], strides = [1, 1]} : vector<8x32xf32> to vector<8x4xf32>
    %46 = arith.truncf %45 : vector<8x4xf32> to vector<8x4xbf16>
    %c0_29 = arith.constant 0 : index
    %c7 = arith.constant 7 : index
    %c0_30 = arith.constant 0 : index
    %c0_31 = arith.constant 0 : index
    %47 = vector.load %arg6[%c0_29, %c7, %c0_30, %c0_31] : memref<1x8x8x4xbf16, #tpu.memory_space<vmem>>, vector<1x1x8x4xbf16>
    %48 = vector.shape_cast %47 : vector<1x1x8x4xbf16> to vector<8x4xbf16>
    %49 = vector.shape_cast %46 : vector<8x4xbf16> to vector<1x1x8x4xbf16>
    tpu.vector_store %arg6[%c0_29, %c7, %c0_30, %c0_31], %49 {strides = array<i32>} : memref<1x8x8x4xbf16, #tpu.memory_space<vmem>>, vector<1x1x8x4xbf16>,
    return
  }
  func.func @transform_0(%arg0: i32, %arg1: i32, %arg2: i32) -> (i32, i32, i32) {
    %c0_i32 = arith.constant 0 : i32
    %c0_i32_0 = arith.constant 0 : i32
    return %arg0, %arg1, %c0_i32 : i32, i32, i32
  }
  func.func @transform_1(%arg0: i32, %arg1: i32, %arg2: i32) -> (i32, i32) {
    %c0_i32 = arith.constant 0 : i32
    %c0_i32_0 = arith.constant 0 : i32
    return %c0_i32, %arg2 : i32, i32
  }
  func.func @transform_2(%arg0: i32, %arg1: i32, %arg2: i32) -> (i32, i32) {
    %c0_i32 = arith.constant 0 : i32
    %c0_i32_0 = arith.constant 0 : i32
    return %c0_i32, %arg2 : i32, i32
  }
  func.func @transform_3(%arg0: i32, %arg1: i32, %arg2: i32) -> (i32, i32, i32, i32) {
    %c0_i32 = arith.constant 0 : i32
    %c0_i32_0 = arith.constant 0 : i32
    return %arg0, %arg2, %arg1, %c0_i32 : i32, i32, i32, i32
  }
}

module attributes {stable_mosaic.version = 11 : i64} {
  func.func @_linear_kernel(%arg0: i32, %arg1: memref<16x32xbf16, #tpu.memory_space<vmem>>, %arg2: memref<32x32xbf16, #tpu.memory_space<vmem>>, %arg3: memref<1x32xf32, #tpu.memory_space<vmem>>, %arg4: memref<16x32xf32, #tpu.memory_space<vmem>>) attributes {dimension_semantics = [#tpu.dimension_semantics<parallel>], iteration_bounds = array<i64: 1>, scalar_prefetch = 0 : i64, scratch_operands = 0 : i64, tpu.core_type = #tpu.core_type<tc>, window_params = [{transform_indices = @transform_0, window_bounds = array<i64: 16, 32>}, {pipeline_mode = #tpu.pipeline_mode<synchronous>, transform_indices = @transform_1, window_bounds = array<i64: 32, 32>}, {pipeline_mode = #tpu.pipeline_mode<synchronous>, transform_indices = @transform_2, window_bounds = array<i64: 1, 32>}, {transform_indices = @transform_3, window_bounds = array<i64: 16, 32>}]} {
    %c0 = arith.constant 0 : index
    %c0_0 = arith.constant 0 : index
    %0 = vector.load %arg1[%c0, %c0_0] : memref<16x32xbf16, #tpu.memory_space<vmem>>, vector<16x32xbf16>
    %c0_1 = arith.constant 0 : index
    %c0_2 = arith.constant 0 : index
    %1 = vector.load %arg2[%c0_1, %c0_2] : memref<32x32xbf16, #tpu.memory_space<vmem>>, vector<32x32xbf16>
    %cst = arith.constant dense<0.000000e+00> : vector<16x32xf32>
    %2 = tpu.matmul %0, %1, %cst {dimension_numbers = #tpu.dot_dimension_numbers<[1], [0], [0], [1], [0, 0, 1, 1], [], []>} : vector<16x32xbf16>, vector<32x32xbf16>, vector<16x32xf32> -> vector<16x32xf32>
    %c0_3 = arith.constant 0 : index
    %c0_4 = arith.constant 0 : index
    %3 = vector.load %arg3[%c0_3, %c0_4] : memref<1x32xf32, #tpu.memory_space<vmem>>, vector<1x32xf32>
    %4 = vector.broadcast %3 : vector<1x32xf32> to vector<16x32xf32>
    %5 = arith.addf %2, %4 : vector<16x32xf32>
    %c0_5 = arith.constant 0 : index
    %c0_6 = arith.constant 0 : index
    %6 = vector.load %arg4[%c0_5, %c0_6] : memref<16x32xf32, #tpu.memory_space<vmem>>, vector<16x32xf32>
    tpu.vector_store %arg4[%c0_5, %c0_6], %5 {strides = array<i32>} : memref<16x32xf32, #tpu.memory_space<vmem>>, vector<16x32xf32>,
    return
  }
  func.func @transform_0(%arg0: i32) -> (i32, i32) {
    %c0_i32 = arith.constant 0 : i32
    %c0_i32_0 = arith.constant 0 : i32
    return %arg0, %c0_i32 : i32, i32
  }
  func.func @transform_1(%arg0: i32) -> (i32, i32) {
    %c0_i32 = arith.constant 0 : i32
    %c0_i32_0 = arith.constant 0 : i32
    %c0_i32_1 = arith.constant 0 : i32
    return %c0_i32, %c0_i32_0 : i32, i32
  }
  func.func @transform_2(%arg0: i32) -> (i32, i32) {
    %c0_i32 = arith.constant 0 : i32
    %c0_i32_0 = arith.constant 0 : i32
    %c0_i32_1 = arith.constant 0 : i32
    return %c0_i32, %c0_i32_0 : i32, i32
  }
  func.func @transform_3(%arg0: i32) -> (i32, i32) {
    %c0_i32 = arith.constant 0 : i32
    %c0_i32_0 = arith.constant 0 : i32
    return %arg0, %c0_i32 : i32, i32
  }
}

</mosaic_0001>

<bundles_post_ra>
// kernel: multi_head_cross_attention.5
= control target key start
LH: loop header
LB: loop body
LE: loop exit
PB: predicated region body
PF: predicated region fallthrough
CT: control target
= control target key end

     0   :  { %8 = vsyncpa [#allocation3], 0  ;;  %s874_s0 = inlined_call_operand.hbm [shape: f32[2,8,32], index: 0, kind: input, shape index: {}]   ;;  %s875_s1 = inlined_call_operand.vmem [shape: bf16[32,32], index: 1, kind: input, shape index: {}]   ;;  %s876_s2 = inlined_call_operand.vmem [shape: f32[1,32], index: 2, kind: input, shape index: {}]   ;;  %s877_s3 = inlined_call_operand.vmem [shape: bf16[2,8,8,4], index: 3, kind: output, shape index: {}]  }
   0x1   :  { %10 = vsyncpa [#allocation3 + $0x1], 0  ;;  %s722_s12 = smov 0   ;;  %s724_s13 = smov 0  }
   0x2   :  { %s726_s14 = smov 0   ;;  %s728_s15 = smov 0  }
   0x3   :  { %s730_s16 = smov 0   ;;  %s732_s17 = smov 0  }
   0x4 LB: > { %s505_s18 = sadd.s32 4294967295, %s690_s17   ;;  %s35_s19 = sadd.s32 1, %s686_s16  ;;  %s690_s17 = sphi %s732_s17, %s16_s17   ;;  %s686_s16 = sphi %s730_s16, %s887_s16   ;;  %s682_s15 = sphi %s728_s15, %s886_s15   ;;  %s678_s14 = sphi %s726_s14, %s885_s14   ;;  %s674_s13 = sphi %s724_s13, %s884_s13   ;;  %s670_s12 = sphi %s722_s12, %s883_s12  }
   0x5   : > { %p37_p0 = scmp.ge.s32.totalorder %s35_s19, 2  ;;  %s44_s20 = sadd.s32 1, %s678_s14 }
   0x6   : > { %p51_p1 = scmp.ne.s32.totalorder %s678_s14, %s674_s13  ;;  %p52_p2 = scmp.eq.s32.totalorder %s690_s17, 0 }
   0x7   : > { %s889_s19 = smov (%p37_p0, %s35_s19), 0  ;;  %p57_p4 = scmp.ne.s32.totalorder %s674_s13, %s670_s12 }
   0x8   : > { %p758_p3 = por %p52_p2, %p51_p1  ;;  %s39_s22 = ssub.s32 %s686_s16, %s889_s19 }
   0x9   : > { %p58_p5 = scmp.eq.s32.totalorder %s505_s18, 0  ;;  %p42_p6 = scmp.eq.s32.totalorder %s39_s22, 0 }
   0xa   : > { %p550_p8 = scmp.lt.s32.totalorder %s690_s17, 2  ;;  %s176_s25 = sand.u32 1, %s678_s14  }
   0xb   : > { %p765_p7 = por %p58_p5, %p57_p4  ;;  %s512_s26 = sshll.u32 %s686_s16, 7 }
   0xc   : > { %s771_s24 = scalar_select %p42_p6, %s678_s14, %s44_s20  }
   0xd   : > { %s511_s27 = sshll.u32 %s176_s25, 3  ;;  %s778_s30 = scalar_lea.hbm %s874_s0, %s512_s26 }
   0xe   : > { %s180_s4 = scalar_lea.vmem [#allocation2], %s511_s27  ;;  %p782_p9 = pnand %p550_p8, %p758_p3 }
   0xf   : > { %s188_s5 = sshll.u32 %s180_s4, 4  ;;  %s177_s7 = scalar_lea.sflag [#allocation3], %s176_s25  ;;  %s786_s5 = int_to_ptr.vmem [resolvable:$true] %s188_s5 }
  0x10   : > { %s610_s8 = scalar_lea.hbm %s778_s30, 128  ;;  %p612_p13 = pneg %p782_p9 }
  0x11   : > { %p611_p12 = scmp.ne.s32.totalorder %s778_s30, %s610_s8  ;;  %s615_s11 = scalar_lea.hbm %s874_s0, 256 }
  0x12   : > { %p616_p2 = scmp.lt.u32.totalorder %s778_s30, %s874_s0  ;;  %p617_p3 = scmp.lt.u32.totalorder %s615_s11, %s610_s8 }
  0x13   : > { %p613_p0 = pnand %p612_p13, %p611_p12  ;;  %p619_p5 = scmp.lt.u32.totalorder %s610_s8, %s778_s30 }
  0x14   : > { %p618_p4 = por %p617_p3, %p616_p2 }
  0x15   : > { %p614_p1 = pneg %p613_p0 }
  0x16   : > { %p620_p6 = por %p619_p5, %p618_p4 }
  0x18   : > { %p621_p8 = pnand %p620_p6, %p614_p1 }
  0x1a   : > { %624 = shalt.err (!%p621_p8)
}
  0x1b   : > { %s625_s20 = scalar_lea.vmem %s786_s5, 128  ;;  %s692_s21 = smov [#allocation2]  }
  0x1c   : > { %p626_p12 = scmp.ne.s32.totalorder %s786_s5, %s625_s20  ;;  %s630_s22 = sshll.u32 %s692_s21, 4  ;;  %s631_s22 = int_to_ptr.vmem [resolvable:$false] %s630_s22 }
  0x1d   : > { %s632_s25 = scalar_lea.vmem %s631_s22, 256  ;;  %p633_p11 = scmp.lt.s32.totalorder %s786_s5, %s631_s22 }
  0x1e   : > { %p628_p0 = pnand %p626_p12, %p612_p13  ;;  %p634_p2 = scmp.lt.s32.totalorder %s632_s25, %s625_s20 }
  0x20   : > { %p629_p10 = pneg %p628_p0  ;;  %p635_p3 = por %p634_p2, %p633_p11 }
  0x22   : > { %p636_p4 = pnand %p635_p3, %p629_p10 }
  0x24   : > { %639 = shalt.err (!%p636_p4)
}
  0x25   : > { %549 = dma.hbm_to_vmem [thread:$0]  (!%p782_p9), %s778_s30, 128, %s786_s5, %s177_s7  }
  0x26   : > { %p881_p1 = scmp.lt.s32.totalorder %s690_s17, 3  ;;  %p882_p5 = scmp.ge.s32.totalorder %s690_s17, 1 }
  0x28   : > { %p194_p13 = pnand %p882_p5, %p881_p1 }
  0x29   : > { %s199_s26 = sand.u32 (!%p194_p13), 1, %s674_s13  }
  0x2a   : > { %197 = sbr.rel (%p194_p13) target bundleno = 405 (0x195), region = 32  ;;  %s514_s27 = sshll.u32 (!%p194_p13), %s199_s26, 3 }
  0x2b   : > { %s200_s28 = scalar_lea.sflag (!%p194_p13), [#allocation3], %s199_s26  ;;  %s203_s29 = scalar_lea.vmem (!%p194_p13), [#allocation2], %s514_s27 }
  0x31   : > { %665 = dma.done.wait (%p765_p7), %s200_s28, 128  }
  0x32   : > { %667 = vsyncadd (%p765_p7), %s200_s28, 4294967168  ;;  %v693_v0 = vmov 0.0   ;;  %vm694_vm0 = vmmov 0   ;;  %v608_v1 = vld [vmem:[%s875_s1] sm:$0xff]   ;;  %v609_v2 = vld [vmem:[%s875_s1 + $0x8] sm:$0xff]   ;;  %vm286_vm1 = vcmask 261120  }
  0x33   : > { %536 = vmatprep.subr.bf16.mxu0 %v693_v0  ;;  %540 = vmatprep.mubr.msk.bf16.mxu0 %vm694_vm0, %v693_v0  ;;  %v261_v3 = vld [vmem:[%s203_s29] sm:$0xff]  ;;  %p248_p7 = scmp.lt.s32.totalorder %s682_s15, 1  ;;  %vm332_vm2 = vcmask 27648   ;;  %s695_s12 = smov 116  }
  0x34   : > { %537 = vmatpush3.bf16.msra.mxu0 %v608_v1  ;;  %v262_v4 = vpack.c.bf16 %v261_v3, %v261_v3  ;;  %v517_v5 = vld [vmem:[%s876_s2] ss:$0 sm:$0xff]  ;;  %s696_s18 = smov 124   ;;  %s698_s20 = smov 120  }
  0x35   : > { %538 = vmatprep.subr.bf16.mxu0 %v693_v0  ;;  %s891_s15 = smov (!%p248_p7, %s682_s15), 1  ;;  %s699_s21 = smov 104  }
  0x36   : > { %s531_s8 = sshll.u32 %s891_s15, 5  ;;  %s697_s15 = smov 112  }
  0x37   : > { %s838_s11 = scalar_lea.vmem %s877_s3, %s531_s8  ;;  %s700_s22 = smov 108  }
  0x38   : > { %539 = vmatpush3.bf16.msra.mxu0 %v609_v2  ;;  %s701_s25 = smov 100  }
  0x3b   : > { %541 = vmatmul.mubr.msk.bf16.vlgmr.msra.gmra.mrb[0].mxu0 %vm286_vm1, %v262_v4 }
 0x10e   : > { %v324_v6 = vpop.f32.mrb[0].mxu0 }
 0x10f   : > { %v325_v7 = vadd.f32 %v517_v5, %v324_v6  ;;  %v542_v8 = vpop.f32.mrb[1].mxu0 }
 0x110   : > { %v327_v9 = vpop.f32.mrb[2].mxu0 }
 0x111   : > { %v330_v10 = vmul.f32 0.5, %v325_v7  ;;  %v543_v11 = vpop.f32.mrb[3].mxu0 }
 0x113   : > { %v331_v12 = vpack.c.bf16 %v330_v10, %v330_v10 }
 0x115   : > { %347 = vrot.lane.b32.xlu1 %v331_v12, %s695_s12  ;;  %337 = vrot.lane.b32.xlu0 %v331_v12, %s696_s18  ;;  %333 = vst.msk [vmem:[%s838_s11] sm:$0xf] %vm332_vm2, %v331_v12 }
 0x119   : > { %352 = vrot.lane.b32.xlu1 %v331_v12, %s697_s15  ;;  %342 = vrot.lane.b32.xlu0 %v331_v12, %s698_s20 }
 0x11d   : > { %362 = vrot.lane.b32.xlu1 %v331_v12, %s699_s21  ;;  %357 = vrot.lane.b32.xlu0 %v331_v12, %s700_s22 }
 0x121   : > { %367 = vrot.lane.b32.xlu0 %v331_v12, %s701_s25 }
 0x187   : > { %v348_v13 = vpop.permute.xlu1 %347  ;;  %v338_v14 = vpop.permute.xlu0 %337 }
 0x188   : > { %524 = vst.msk [vmem:[%s838_s11 + $0xc] sm:$0xf] %vm332_vm2, %v348_v13  ;;  %522 = vst.msk [vmem:[%s838_s11 + $0x4] sm:$0xf] %vm332_vm2, %v338_v14 }
 0x18b   : > { %v353_v15 = vpop.permute.xlu1 %352  ;;  %v343_v16 = vpop.permute.xlu0 %342 }
 0x18c   : > { %525 = vst.msk [vmem:[%s838_s11 + $0x10] sm:$0xf] %vm332_vm2, %v353_v15  ;;  %523 = vst.msk [vmem:[%s838_s11 + $0x8] sm:$0xf] %vm332_vm2, %v343_v16 }
 0x18f   : > { %v363_v17 = vpop.permute.xlu1 %362  ;;  %v358_v18 = vpop.permute.xlu0 %357 }
 0x190   : > { %527 = vst.msk [vmem:[%s838_s11 + $0x18] sm:$0xf] %vm332_vm2, %v363_v17  ;;  %526 = vst.msk [vmem:[%s838_s11 + $0x14] sm:$0xf] %vm332_vm2, %v358_v18 }
 0x193   : > { %v368_v19 = vpop.permute.xlu0 %367 }
 0x194   : > { %528 = vst.msk [vmem:[%s838_s11 + $0x1c] sm:$0xf] %vm332_vm2, %v368_v19 }
 0x195 PF: > { %s16_s17 = sadd.s32 1, %s690_s17   ;;  %s883_s12 = smov %s674_s13 }
 0x196   : > { %p13_p9 = scmp.ge.s32.totalorder %s16_s17, 4   ;;  %s884_s13 = smov %s678_s14 }
 0x197   : > { %s885_s14 = smov %s771_s24  ;;  %s886_s15 = smov %s686_s16 }
 0x198   : > { %s887_s16 = smov %s889_s19  ;;  %15 = sbr.rel (!%p13_p9) target bundleno = 4 (0x4), region = 85 }
 0x19f   :  { %408 = vsyncpa [#allocation3], 1 }
 0x1a0   :  { %410 = vsyncpa [#allocation3 + $0x1], 1 }

// kernel: multi_head_cross_attention.4
= control target key start
LH: loop header
LB: loop body
LE: loop exit
PB: predicated region body
PF: predicated region fallthrough
CT: control target
= control target key end

     0   :  { %s797_s15 = smov 0   ;;  %s799_s16 = smov 0   ;;  %s876_s0 = inlined_call_operand.vmem [shape: f32[2,8,32], index: 0, kind: input, shape index: {}]   ;;  %s877_s1 = inlined_call_operand.vmem [shape: bf16[32,64], index: 1, kind: input, shape index: {}]   ;;  %s878_s2 = inlined_call_operand.vmem [shape: f32[1,64], index: 2, kind: input, shape index: {}]   ;;  %s879_s3 = inlined_call_operand.vmem [shape: bf16[2,8,8,4], index: 3, kind: output, shape index: {0}]   ;;  %s880_s4 = inlined_call_operand.vmem [shape: bf16[2,8,8,4], index: 4, kind: output, shape index: {1}]  }
   0x1   :  { %s801_s17 = smov 0  }
   0x2 LB: > { %s34_s18 = sadd.s32 1, %s749_s16  ;;  %p647_p0 = scmp.ge.s32.totalorder %s753_s17, 1  ;;  %s753_s17 = sphi %s801_s17, %s15_s17   ;;  %s749_s16 = sphi %s799_s16, %s882_s16   ;;  %s745_s15 = sphi %s797_s15, %s881_s15  }
   0x3   : > { %p36_p1 = scmp.ge.s32.totalorder %s34_s18, 2  ;;  %p213_p2 = scmp.lt.s32.totalorder %s753_s17, 3 }
   0x5   : > { %s884_s18 = smov (%p36_p1, %s34_s18), 0  ;;  %p214_p3 = pnand %p647_p0, %p213_p2 }
   0x6   : > { %v729_v0 = vld [vmem:[%s877_s1] sm:$0xff] (!%p214_p3)   ;;  %v755_v1 = vmov (!%p214_p3), 0.0   ;;  %v730_v2 = vld [vmem:[%s877_s1 + $0x8] sm:$0xff] (!%p214_p3)   ;;  %vm756_vm0 = vmmov (!%p214_p3), 0   ;;  %p267_p4 = scmp.lt.s32.totalorder (!%p214_p3), %s745_s15, 1  ;;  %vm333_vm1 = vcmask (!%p214_p3), 261120  }
   0x7   : > { %217 = sbr.rel (%p214_p3) target bundleno = 380 (0x17c), region = 32  ;;  %680 = vmatprep.subr.bf16.mxu0 (!%p214_p3), %v755_v1  ;;  %684 = vmatprep.mubr.msk.bf16.mxu0 (!%p214_p3), %vm756_vm0, %v755_v1  ;;  %v653_v5 = vld [vmem:[%s878_s2] ss:$0 sm:$0xff] (!%p214_p3)  ;;  %vm378_vm2 = vcmask (!%p214_p3), 27648   ;;  %s757_s7 = smov (!%p214_p3), 116  }
   0x8   : > { %681 = vmatpush3.bf16.msra.mxu0 (!%p214_p3), %v729_v0  ;;  %s758_s8 = smov (!%p214_p3), 124   ;;  %s759_s9 = smov (!%p214_p3), 112  }
   0x9   : > { %682 = vmatprep.subr.bf16.mxu0 (!%p214_p3), %v755_v1  ;;  %s760_s10 = smov (!%p214_p3), 120   ;;  %s761_s11 = smov (!%p214_p3), 104  }
   0xa   : > { %s762_s12 = smov (!%p214_p3), 108   ;;  %s763_s13 = smov (!%p214_p3), 96  }
   0xb   : > { %s764_s14 = smov (!%p214_p3), 100   ;;  %s765_s19 = smov (!%p214_p3), 88  }
   0xc   : > { %683 = vmatpush3.bf16.msra.mxu0 (!%p214_p3), %v730_v2  ;;  %s766_s20 = smov (!%p214_p3), 92   ;;  %s767_s21 = smov (!%p214_p3), 80  }
   0xd   : > { %s768_s22 = smov (!%p214_p3), 84   ;;  %s770_s24 = smov (!%p214_p3), 76  }
   0xe   : > { %s886_s15 = smov (!%p267_p4, %s745_s15), 1  ;;  %s771_s25 = smov 68  }
   0xf   : > { %s648_s23 = sshll.u32 %s886_s15, 3  ;;  %s674_s27 = sshll.u32 %s886_s15, 5 }
  0x10   : > { %s273_s26 = scalar_lea.vmem %s876_s0, %s648_s23  ;;  %s836_s6 = scalar_lea.vmem %s879_s3, %s674_s27 }
  0x11   : > { %v308_v3 = vld [vmem:[%s273_s26] sm:$0xff]  ;;  %s769_s23 = smov 72   ;;  %s305_s29 = scalar_lea.vmem %s880_s4, %s674_s27 }
  0x12   : > { %v309_v4 = vpack.c.bf16 %v308_v3, %v308_v3 }
  0x14   : > { %685 = vmatmul.mubr.msk.bf16.vlgmr.msra.gmra.mrb[0].mxu0 %vm333_vm1, %v309_v4 }
  0xe7   : > { %v371_v6 = vpop.f32.mrb[0].mxu0 }
  0xe8   : > { %v372_v7 = vadd.f32 %v653_v5, %v371_v6  ;;  %v686_v8 = vpop.f32.mrb[1].mxu0 }
  0xe9   : > { %v374_v9 = vpop.f32.mrb[2].mxu0 }
  0xea   : > { %v377_v10 = vpack.c.bf16 %v372_v7, %v372_v7  ;;  %v687_v11 = vpop.f32.mrb[3].mxu0 }
  0xec   : > { %392 = vrot.lane.b32.xlu1 %v377_v10, %s757_s7  ;;  %383 = vrot.lane.b32.xlu0 %v377_v10, %s758_s8  ;;  %379 = vst.msk [vmem:[%s836_s6] sm:$0xf] %vm378_vm2, %v377_v10 }
  0xf0   : > { %397 = vrot.lane.b32.xlu1 %v377_v10, %s759_s9  ;;  %387 = vrot.lane.b32.xlu0 %v377_v10, %s760_s10 }
  0xf4   : > { %407 = vrot.lane.b32.xlu1 %v377_v10, %s761_s11  ;;  %402 = vrot.lane.b32.xlu0 %v377_v10, %s762_s12 }
  0xf8   : > { %417 = vrot.lane.b32.xlu1 %v377_v10, %s763_s13  ;;  %412 = vrot.lane.b32.xlu0 %v377_v10, %s764_s14 }
  0xfc   : > { %427 = vrot.lane.b32.xlu1 %v377_v10, %s765_s19  ;;  %422 = vrot.lane.b32.xlu0 %v377_v10, %s766_s20 }
 0x100   : > { %437 = vrot.lane.b32.xlu1 %v377_v10, %s767_s21  ;;  %432 = vrot.lane.b32.xlu0 %v377_v10, %s768_s22 }
 0x104   : > { %447 = vrot.lane.b32.xlu1 %v377_v10, %s769_s23  ;;  %442 = vrot.lane.b32.xlu0 %v377_v10, %s770_s24 }
 0x108   : > { %452 = vrot.lane.b32.xlu0 %v377_v10, %s771_s25 }
 0x15e   : > { %v393_v12 = vpop.permute.xlu1 %392  ;;  %v384_v13 = vpop.permute.xlu0 %383 }
 0x15f   : > { %659 = vst.msk [vmem:[%s305_s29 + $0x4] sm:$0xf] %vm378_vm2, %v393_v12  ;;  %386 = vst.msk [vmem:[%s305_s29] sm:$0xf] %vm378_vm2, %v384_v13 }
 0x162   : > { %v398_v14 = vpop.permute.xlu1 %397  ;;  %v388_v15 = vpop.permute.xlu0 %387 }
 0x163   : > { %660 = vst.msk [vmem:[%s836_s6 + $0x8] sm:$0xf] %vm378_vm2, %v398_v14  ;;  %658 = vst.msk [vmem:[%s836_s6 + $0x4] sm:$0xf] %vm378_vm2, %v388_v15 }
 0x166   : > { %v408_v16 = vpop.permute.xlu1 %407  ;;  %v403_v17 = vpop.permute.xlu0 %402 }
 0x167   : > { %662 = vst.msk [vmem:[%s836_s6 + $0xc] sm:$0xf] %vm378_vm2, %v408_v16  ;;  %661 = vst.msk [vmem:[%s305_s29 + $0x8] sm:$0xf] %vm378_vm2, %v403_v17 }
 0x16a   : > { %v418_v18 = vpop.permute.xlu1 %417  ;;  %v413_v19 = vpop.permute.xlu0 %412 }
 0x16b   : > { %664 = vst.msk [vmem:[%s836_s6 + $0x10] sm:$0xf] %vm378_vm2, %v418_v18  ;;  %663 = vst.msk [vmem:[%s305_s29 + $0xc] sm:$0xf] %vm378_vm2, %v413_v19 }
 0x16e   : > { %v428_v20 = vpop.permute.xlu1 %427  ;;  %v423_v21 = vpop.permute.xlu0 %422 }
 0x16f   : > { %666 = vst.msk [vmem:[%s836_s6 + $0x14] sm:$0xf] %vm378_vm2, %v428_v20  ;;  %665 = vst.msk [vmem:[%s305_s29 + $0x10] sm:$0xf] %vm378_vm2, %v423_v21 }
 0x172   : > { %v438_v22 = vpop.permute.xlu1 %437  ;;  %v433_v23 = vpop.permute.xlu0 %432 }
 0x173   : > { %668 = vst.msk [vmem:[%s836_s6 + $0x18] sm:$0xf] %vm378_vm2, %v438_v22  ;;  %667 = vst.msk [vmem:[%s305_s29 + $0x14] sm:$0xf] %vm378_vm2, %v433_v23 }
 0x176   : > { %v448_v24 = vpop.permute.xlu1 %447  ;;  %v443_v25 = vpop.permute.xlu0 %442 }
 0x177   : > { %670 = vst.msk [vmem:[%s836_s6 + $0x1c] sm:$0xf] %vm378_vm2, %v448_v24  ;;  %669 = vst.msk [vmem:[%s305_s29 + $0x18] sm:$0xf] %vm378_vm2, %v443_v25 }
 0x17a   : > { %v453_v26 = vpop.permute.xlu0 %452 }
 0x17b   : > { %671 = vst.msk [vmem:[%s305_s29 + $0x1c] sm:$0xf] %vm378_vm2, %v453_v26 }
 0x17c PF: > { %s15_s17 = sadd.s32 1, %s753_s17   ;;  %s881_s15 = smov %s749_s16 }
 0x17d   : > { %p12_p5 = scmp.ge.s32.totalorder %s15_s17, 4   ;;  %s882_s16 = smov %s884_s18 }
 0x17f   :  { %14 = sbr.rel (!%p12_p5) target bundleno = 2 (0x2), region = 94 }

// kernel: multi_head_cross_attention.6
= control target key start
LH: loop header
LB: loop body
LE: loop exit
PB: predicated region body
PF: predicated region fallthrough
CT: control target
= control target key end

     0   :  { %s1841_s12 = smov 0   ;;  %s1843_s13 = smov 0   ;;  %s2231_s0 = inlined_call_operand.vmem [shape: bf16[2,8,8,4], index: 0, kind: input, shape index: {}]   ;;  %s2232_s1 = inlined_call_operand.vmem [shape: bf16[2,8,8,4], index: 1, kind: input, shape index: {}]   ;;  %s2233_s2 = inlined_call_operand.vmem [shape: bf16[2,8,8,4], index: 2, kind: input, shape index: {}]   ;;  %s2234_s3 = inlined_call_operand.vmem [shape: bf16[2,8,8,4], index: 3, kind: output, shape index: {}]  }
   0x1   :  { %s1845_s14 = smov 0  }
   0x2 LB: > { %s32_s15 = sadd.s32 1, %s1811_s13  ;;  %p1556_p0 = scmp.ge.s32.totalorder %s1815_s14, 1  ;;  %s1815_s14 = sphi %s1845_s14, %s13_s14   ;;  %s1811_s13 = sphi %s1843_s13, %s2236_s13   ;;  %s1807_s12 = sphi %s1841_s12, %s2235_s12  }
   0x3   : > { %p34_p1 = scmp.ge.s32.totalorder %s32_s15, 2  ;;  %p193_p2 = scmp.lt.s32.totalorder %s1815_s14, 3 }
   0x5   : > { %s2238_s15 = smov (%p34_p1, %s32_s15), 0  ;;  %p194_p3 = pnand %p1556_p0, %p193_p2 }
   0x6   : > { %p239_p4 = scmp.lt.s32.totalorder (!%p194_p3), %s1807_s12, 1  ;;  %vm293_vm0 = vcmask (!%p194_p3), 31744   ;;  %v1817_v0 = vmov (!%p194_p3), 0.0   ;;  %vm1818_vm1 = vmmov (!%p194_p3), 0   ;;  %vm276_vm2 = vcmask (!%p194_p3), 7168  }
   0x7   : > { %197 = sbr.rel (%p194_p3) target bundleno = 851 (0x353), region = 32  ;;  %1619 = vmatprep.subr.bf16.mxu0 (!%p194_p3), %v1817_v0  ;;  %294 = vst.msk [vmem:[#allocation4] sm:$0xff] (!%p194_p3), %vm293_vm0, %v1817_v0  ;;  %295 = vst.msk [vmem:[#allocation4 + $0x8] sm:$0xff] (!%p194_p3), %vm293_vm0, %v1817_v0  ;;  %1625 = vmatprep.subr.bf16.mxu1 (!%p194_p3), %v1817_v0  ;;  %v1819_v25 = vmov (!%p194_p3), -inf   ;;  %vm703_vm3 = vcmask (!%p194_p3), 64512   ;;  %v1820_v52 = vmov (!%p194_p3), 0  }
   0x8   : > { %296 = vst.msk [vmem:[#allocation4 + $0x10] sm:$0xff] (!%p194_p3), %vm293_vm0, %v1817_v0  ;;  %297 = vst.msk [vmem:[#allocation4 + $0x18] sm:$0xff] (!%p194_p3), %vm293_vm0, %v1817_v0  ;;  %1621 = vmatprep.mubr.msk.bf16.mxu0 (!%p194_p3), %vm1818_vm1, %v1817_v0  ;;  %1627 = vmatprep.mubr.msk.bf16.mxu1 (!%p194_p3), %vm1818_vm1, %v1817_v0  ;;  %vm948_vm4 = vcmask (!%p194_p3), 1043456   ;;  %vm1421_vm5 = vcmask (!%p194_p3), 27648  }
   0x9   : > { %298 = vst.msk [vmem:[#allocation4 + $0x20] sm:$0xff] (!%p194_p3), %vm293_vm0, %v1817_v0  ;;  %299 = vst.msk [vmem:[#allocation4 + $0x28] sm:$0xff] (!%p194_p3), %vm293_vm0, %v1817_v0  ;;  %1743 = vset.pattern.permute.xlu0 (!%p194_p3), %v1820_v52  ;;  %1744 = vset.pattern.permute.xlu1 (!%p194_p3), %v1820_v52 }
   0xa   : > { %300 = vst.msk [vmem:[#allocation4 + $0x30] sm:$0xff] (!%p194_p3), %vm293_vm0, %v1817_v0  ;;  %301 = vst.msk [vmem:[#allocation4 + $0x38] sm:$0xff] (!%p194_p3), %vm293_vm0, %v1817_v0 }
   0xb   : > { %277 = vst.msk [vmem:[#allocation2] sm:$0xff] (!%p194_p3), %vm276_vm2, %v1819_v25  ;;  %278 = vst.msk [vmem:[#allocation2 + $0x8] sm:$0xff] (!%p194_p3), %vm276_vm2, %v1819_v25 }
   0xc   : > { %279 = vst.msk [vmem:[#allocation2 + $0x10] sm:$0xff] (!%p194_p3), %vm276_vm2, %v1819_v25  ;;  %280 = vst.msk [vmem:[#allocation2 + $0x18] sm:$0xff] (!%p194_p3), %vm276_vm2, %v1819_v25 }
   0xd   : > { %281 = vst.msk [vmem:[#allocation2 + $0x20] sm:$0xff] (!%p194_p3), %vm276_vm2, %v1819_v25  ;;  %282 = vst.msk [vmem:[#allocation2 + $0x28] sm:$0xff] (!%p194_p3), %vm276_vm2, %v1819_v25 }
   0xe   : > { %s2240_s12 = smov (!%p239_p4, %s1807_s12), 1  ;;  %283 = vst.msk [vmem:[#allocation2 + $0x30] sm:$0xff] %vm276_vm2, %v1819_v25  ;;  %284 = vst.msk [vmem:[#allocation2 + $0x38] sm:$0xff] %vm276_vm2, %v1819_v25 }
   0xf   : > { %s1881_s16 = sshll.u32 %s2240_s12, 5  ;;  %285 = vst.msk [vmem:[#allocation3] sm:$0xff] %vm276_vm2, %v1817_v0  ;;  %286 = vst.msk [vmem:[#allocation3 + $0x8] sm:$0xff] %vm276_vm2, %v1817_v0 }
  0x10   : > { %s1887_s19 = scalar_lea.vmem %s2232_s1, %s1881_s16  ;;  %s1897_s22 = scalar_lea.vmem %s2231_s0, %s1881_s16  ;;  %287 = vst.msk [vmem:[#allocation3 + $0x10] sm:$0xff] %vm276_vm2, %v1817_v0  ;;  %288 = vst.msk [vmem:[#allocation3 + $0x18] sm:$0xff] %vm276_vm2, %v1817_v0 }
  0x11   : > { %v310_v1 = vld [vmem:[%s1887_s19] sm:$0xf]  ;;  %v311_v2 = vld [vmem:[%s1887_s19 + $0x4] sm:$0xf]  ;;  %v312_v5 = vld [vmem:[%s1887_s19 + $0x8] sm:$0xf]  ;;  %s2050_s25 = scalar_lea.vmem %s2233_s2, %s1881_s16  ;;  %s2204_s28 = scalar_lea.vmem %s2234_s3, %s1881_s16 }
  0x12   : > { %v331_v3 = vsel %vm293_vm0, %v310_v1, 0  ;;  %v377_v4 = vsel %vm293_vm0, %v311_v2, 0  ;;  %v313_v6 = vld [vmem:[%s1887_s19 + $0xc] sm:$0xf]  ;;  %v302_v7 = vld [vmem:[%s1897_s22] sm:$0xf] }
  0x13   : > { %1620 = vmatpush3.bf16.xpose.msra.mxu0 %v331_v3  ;;  %1626 = vmatpush3.bf16.xpose.msra.mxu1 %v377_v4  ;;  %v303_v8 = vld [vmem:[%s1897_s22 + $0x4] sm:$0xf]  ;;  %v423_v9 = vsel %vm293_vm0, %v312_v5, 0  ;;  %v469_v10 = vsel %vm293_vm0, %v313_v6, 0  ;;  %v314_v11 = vld [vmem:[%s1887_s19 + $0x10] sm:$0xf] }
  0x14   : > { %1631 = vmatprep.subr.bf16.mxu0 %v1817_v0  ;;  %1637 = vmatprep.subr.bf16.mxu1 %v1817_v0  ;;  %v315_v12 = vld [vmem:[%s1887_s19 + $0x14] sm:$0xf]  ;;  %v304_v13 = vld [vmem:[%s1897_s22 + $0x8] sm:$0xf]  ;;  %v305_v14 = vld [vmem:[%s1897_s22 + $0xc] sm:$0xf] }
  0x15   : > { %v515_v15 = vsel %vm293_vm0, %v314_v11, 0  ;;  %v561_v16 = vsel %vm293_vm0, %v315_v12, 0  ;;  %v316_v17 = vld [vmem:[%s1887_s19 + $0x18] sm:$0xf]  ;;  %v317_v18 = vld [vmem:[%s1887_s19 + $0x1c] sm:$0xf] }
  0x16   : > { %v306_v19 = vld [vmem:[%s1897_s22 + $0x10] sm:$0xf]  ;;  %v307_v20 = vld [vmem:[%s1897_s22 + $0x14] sm:$0xf]  ;;  %v607_v21 = vsel %vm293_vm0, %v316_v17, 0  ;;  %v653_v22 = vsel %vm293_vm0, %v317_v18, 0 }
  0x17   : > { %v308_v23 = vld [vmem:[%s1897_s22 + $0x18] sm:$0xf]  ;;  %v309_v24 = vld [vmem:[%s1897_s22 + $0x1c] sm:$0xf]  ;;  %289 = vst.msk [vmem:[#allocation3 + $0x20] sm:$0xff] %vm276_vm2, %v1817_v0  ;;  %290 = vst.msk [vmem:[#allocation3 + $0x28] sm:$0xff] %vm276_vm2, %v1817_v0 }
  0x18   : > { %291 = vst.msk [vmem:[#allocation3 + $0x30] sm:$0xff] %vm276_vm2, %v1817_v0  ;;  %292 = vst.msk [vmem:[#allocation3 + $0x38] sm:$0xff] %vm276_vm2, %v1817_v0  ;;  %v2007_v4 = vld [vmem:[#allocation2] sm:$0xff]  ;;  %v2022_v11 = vld [vmem:[#allocation2 + $0x10] sm:$0xff] }
  0x19   : > { %v323_v52 = vld [vmem:[%s2050_s25 + $0x14] sm:$0xf] }
  0x1a   : > { %1622 = vmatmul.mubr.msk.bf16.vlgmr.msra.gmra.mrb[0].mxu0 %vm293_vm0, %v302_v7  ;;  %1628 = vmatmul.mubr.msk.bf16.vlgmr.msra.gmra.mrb[0].mxu1 %vm293_vm0, %v303_v8  ;;  %v2012_v7 = vld [vmem:[#allocation2 + $0x8] sm:$0xff] }
  0x1b   : > { %1632 = vmatpush3.bf16.xpose.msra.mxu0 %v423_v9  ;;  %1638 = vmatpush3.bf16.xpose.msra.mxu1 %v469_v10 }
  0x1c   : > { %1633 = vmatprep.mubr.msk.bf16.mxu0 %vm1818_vm1, %v1817_v0  ;;  %1643 = vmatprep.subr.bf16.mxu0 %v1817_v0 }
  0x1d   : > { %1639 = vmatprep.mubr.msk.bf16.mxu1 %vm1818_vm1, %v1817_v0  ;;  %1649 = vmatprep.subr.bf16.mxu1 %v1817_v0 }
  0x22   : > { %1634 = vmatmul.mubr.msk.bf16.vlgmr.msra.gmra.mrb[4].mxu0 %vm293_vm0, %v304_v13  ;;  %1640 = vmatmul.mubr.msk.bf16.vlgmr.msra.gmra.mrb[4].mxu1 %vm293_vm0, %v305_v14 }
  0x23   : > { %1644 = vmatpush3.bf16.xpose.msra.mxu0 %v515_v15  ;;  %1650 = vmatpush3.bf16.xpose.msra.mxu1 %v561_v16  ;;  %v2032_v15 = vld [vmem:[#allocation2 + $0x18] sm:$0xff] }
  0x24   : > { %1645 = vmatprep.mubr.msk.bf16.mxu0 %vm1818_vm1, %v1817_v0  ;;  %1655 = vmatprep.subr.bf16.mxu0 %v1817_v0 }
  0x25   : > { %1651 = vmatprep.mubr.msk.bf16.mxu1 %vm1818_vm1, %v1817_v0  ;;  %1661 = vmatprep.subr.bf16.mxu1 %v1817_v0 }
  0x2a   : > { %1646 = vmatmul.mubr.msk.bf16.vlgmr.msra.gmra.mrb[8].mxu0 %vm293_vm0, %v306_v19  ;;  %1652 = vmatmul.mubr.msk.bf16.vlgmr.msra.gmra.mrb[8].mxu1 %vm293_vm0, %v307_v20  ;;  %v2042_v19 = vld [vmem:[#allocation2 + $0x20] sm:$0xff]  ;;  %v2044_v20 = vld [vmem:[#allocation2 + $0x28] sm:$0xff] }
  0x2b   : > { %1656 = vmatpush3.bf16.xpose.msra.mxu0 %v607_v21  ;;  %1662 = vmatpush3.bf16.xpose.msra.mxu1 %v653_v22  ;;  %v318_v22 = vld [vmem:[%s2050_s25] sm:$0xf] }
  0x2c   : > { %1657 = vmatprep.mubr.msk.bf16.mxu0 %vm1818_vm1, %v1817_v0  ;;  %1663 = vmatprep.mubr.msk.bf16.mxu1 %vm1818_vm1, %v1817_v0  ;;  %v950_v25 = vsel %vm948_vm4, %v318_v22, 0 }
  0x2d   : > { %1667 = vmatprep.subr.bf16.mxu0 %v1817_v0  ;;  %1673 = vmatprep.subr.bf16.mxu1 %v1817_v0 }
  0x32   : > { %1658 = vmatmul.mubr.msk.bf16.vlgmr.msra.gmra.mrb[12].mxu0 %vm293_vm0, %v308_v23  ;;  %1664 = vmatmul.mubr.msk.bf16.vlgmr.msra.gmra.mrb[12].mxu1 %vm293_vm0, %v309_v24 }
  0x33   : > { %1669 = vmatprep.mubr.msk.bf16.mxu0 %vm1818_vm1, %v1817_v0  ;;  %1675 = vmatprep.mubr.msk.bf16.mxu1 %vm1818_vm1, %v1817_v0 }
  0x34   : > { %1668 = vmatpush3.bf16.msra.mxu0 %v950_v25 }
  0x35   : > { %1679 = vmatprep.subr.bf16.mxu0 %v1817_v0 }
  0xed   : > { %v1975_v26 = vpop.f32.mrb[0].mxu0  ;;  %v1977_v27 = vpop.f32.mrb[0].mxu1 }
  0xee   : > { %v1623_v28 = vpop.f32.mrb[1].mxu0  ;;  %v704_v29 = vsel %vm703_vm3, %v1975_v26, -inf  ;;  %v1629_v30 = vpop.f32.mrb[1].mxu1  ;;  %v707_v35 = vsel %vm703_vm3, %v1977_v27, -inf }
  0xef   : > { %705 = vmax.xlane.f32.xlu0 %v704_v29  ;;  %v370_v31 = vpop.f32.mrb[2].mxu0  ;;  %v416_v32 = vpop.f32.mrb[2].mxu1 }
  0xf0   : > { %v1624_v33 = vpop.f32.mrb[3].mxu0  ;;  %v1630_v34 = vpop.f32.mrb[3].mxu1  ;;  %v319_v32 = vld [vmem:[%s2050_s25 + $0x4] sm:$0xf] }
  0xf1   : > { %v996_v33 = vsel %vm948_vm4, %v319_v32, 0  ;;  %v2077_v34 = vld [vmem:[#allocation2 + $0x30] sm:$0xff] }
  0xf2   : > { %1674 = vmatpush3.bf16.msra.mxu1 %v996_v33 }
  0xf3   : > { %708 = vmax.xlane.f32.xlu0 %v707_v35  ;;  %v2079_v35 = vld [vmem:[#allocation2 + $0x38] sm:$0xff]  ;;  %1685 = vmatprep.subr.bf16.mxu1 %v1817_v0 }
  0xf5   : > { %v1983_v36 = vpop.f32.mrb[4].mxu0  ;;  %v1985_v37 = vpop.f32.mrb[4].mxu1 }
  0xf6   : > { %v1635_v38 = vpop.f32.mrb[5].mxu0  ;;  %v710_v39 = vsel %vm703_vm3, %v1983_v36, -inf  ;;  %v1641_v40 = vpop.f32.mrb[5].mxu1  ;;  %v713_v45 = vsel %vm703_vm3, %v1985_v37, -inf }
  0xf7   : > { %711 = vmax.xlane.f32.xlu1 %v710_v39  ;;  %v462_v41 = vpop.f32.mrb[6].mxu0  ;;  %v508_v42 = vpop.f32.mrb[6].mxu1  ;;  %v320_v38 = vld [vmem:[%s2050_s25 + $0x8] sm:$0xf] }
  0xf8   : > { %v1636_v43 = vpop.f32.mrb[7].mxu0  ;;  %v1642_v44 = vpop.f32.mrb[7].mxu1  ;;  %v1042_v41 = vsel %vm948_vm4, %v320_v38, 0 }
  0xfb   : > { %714 = vmax.xlane.f32.xlu1 %v713_v45 }
  0xfd   : > { %v1991_v46 = vpop.f32.mrb[8].mxu0  ;;  %v1993_v47 = vpop.f32.mrb[8].mxu1 }
  0xfe   : > { %v1647_v48 = vpop.f32.mrb[9].mxu0  ;;  %v716_v49 = vsel %vm703_vm3, %v1991_v46, -inf  ;;  %v1653_v50 = vpop.f32.mrb[9].mxu1  ;;  %v719_v51 = vsel %vm703_vm3, %v1993_v47, -inf }
  0xff   : > { %717 = vmax.xlane.f32.xlu0 %v716_v49  ;;  %v554_v53 = vpop.f32.mrb[10].mxu0  ;;  %v600_v54 = vpop.f32.mrb[10].mxu1  ;;  %720 = vmax.xlane.f32.xlu1 %v719_v51  ;;  %v321_v48 = vld [vmem:[%s2050_s25 + $0xc] sm:$0xf]  ;;  %v322_v50 = vld [vmem:[%s2050_s25 + $0x10] sm:$0xf] }
 0x100   : > { %v1648_v55 = vpop.f32.mrb[11].mxu0  ;;  %v1654_v56 = vpop.f32.mrb[11].mxu1  ;;  %v1088_v49 = vsel %vm948_vm4, %v321_v48, 0  ;;  %v1134_v51 = vsel %vm948_vm4, %v322_v50, 0  ;;  %v2107_v53 = vsel %vm948_vm4, %v323_v52, 0 }
 0x101   : > { %v324_v54 = vld [vmem:[%s2050_s25 + $0x18] sm:$0xf]  ;;  %v325_v56 = vld [vmem:[%s2050_s25 + $0x1c] sm:$0xf] }
 0x102   : > { %v2111_v55 = vsel %vm948_vm4, %v324_v54, 0 }
 0x105   : > { %v1999_v57 = vpop.f32.mrb[12].mxu0  ;;  %v2001_v58 = vpop.f32.mrb[12].mxu1 }
 0x106   : > { %v1659_v59 = vpop.f32.mrb[13].mxu0  ;;  %v722_v60 = vsel %vm703_vm3, %v1999_v57, -inf  ;;  %v1665_v61 = vpop.f32.mrb[13].mxu1  ;;  %v725_v62 = vsel %vm703_vm3, %v2001_v58, -inf }
 0x107   : > { %723 = vmax.xlane.f32.xlu0 %v722_v60  ;;  %v646_v63 = vpop.f32.mrb[14].mxu0  ;;  %v692_v1 = vpop.f32.mrb[14].mxu1  ;;  %726 = vmax.xlane.f32.xlu1 %v725_v62  ;;  %v2115_v59 = vsel %vm948_vm4, %v325_v56, 0 }
 0x108   : > { %v1660_v2 = vpop.f32.mrb[15].mxu0  ;;  %v1666_v3 = vpop.f32.mrb[15].mxu1 }
 0x17c   : > { %v706_v5 = vpop.xlane.xlu0 %705 }
 0x17d   : > { %v2010_v6 = vmax.f32 %v2007_v4, %v706_v5 }
 0x17f   : > { %v736_v8 = vsub.f32 %v2007_v4, %v2010_v6  ;;  %1330 = vst.msk [vmem:[#allocation2] sm:$0xff] %vm276_vm2, %v2010_v6  ;;  %762 = vperm.xlu0 %1743, %v2010_v6  }
 0x180   : > { %v709_v9 = vpop.xlane.xlu0 %708 }
 0x181   : > { %v2020_v10 = vmax.f32 %v2012_v7, %v709_v9 }
 0x183   : > { %v737_v12 = vsub.f32 %v2012_v7, %v2020_v10  ;;  %1331 = vst.msk [vmem:[#allocation2 + $0x8] sm:$0xff] %vm276_vm2, %v2020_v10  ;;  %767 = vperm.xlu1 %1744, %v2020_v10  }
 0x184   : > { %v712_v13 = vpop.xlane.xlu1 %711 }
 0x185   : > { %v2030_v14 = vmax.f32 %v2022_v11, %v712_v13 }
 0x187   : > { %v738_v16 = vsub.f32 %v2022_v11, %v2030_v14  ;;  %1332 = vst.msk [vmem:[#allocation2 + $0x10] sm:$0xff] %vm276_vm2, %v2030_v14  ;;  %772 = vperm.xlu1 %1744, %v2030_v14  }
 0x188   : > { %v715_v17 = vpop.xlane.xlu1 %714 }
 0x189   : > { %v2040_v18 = vmax.f32 %v2032_v15, %v715_v17 }
 0x18b   : > { %v739_v21 = vsub.f32 %v2032_v15, %v2040_v18  ;;  %1333 = vst.msk [vmem:[#allocation2 + $0x18] sm:$0xff] %vm276_vm2, %v2040_v18  ;;  %777 = vperm.xlu1 %1744, %v2040_v18  }
 0x18c   : > { %v718_v23 = vpop.xlane.xlu0 %717  ;;  %v721_v24 = vpop.xlane.xlu1 %720 }
 0x18d   : > { %v2060_v28 = vmax.f32 %v2042_v19, %v718_v23  ;;  %v2063_v29 = vmax.f32 %v2044_v20, %v721_v24 }
 0x18f   : > { %v740_v30 = vsub.f32 %v2042_v19, %v2060_v28  ;;  %1334 = vst.msk [vmem:[#allocation2 + $0x20] sm:$0xff] %vm276_vm2, %v2060_v28  ;;  %782 = vperm.xlu1 %1744, %v2060_v28   ;;  %v741_v31 = vsub.f32 %v2044_v20, %v2063_v29  ;;  %1335 = vst.msk [vmem:[#allocation2 + $0x28] sm:$0xff] %vm276_vm2, %v2063_v29  ;;  %v824_v20 = vld [vmem:[#allocation3] sm:$0xff] }
 0x191   : > { %v752_v7 = vmul.f32 1.442695, %v740_v30  ;;  %v754_v4 = vmul.f32 1.442695, %v741_v31 }
 0x193   : > { %787 = vperm.xlu1 %1744, %v2063_v29   ;;  %v825_v29 = vld [vmem:[#allocation3 + $0x8] sm:$0xff] }
 0x194   : > { %v724_v39 = vpop.xlane.xlu0 %723  ;;  %v727_v40 = vpop.xlane.xlu1 %726 }
 0x195   : > { %v2086_v42 = vmax.f32 %v2077_v34, %v724_v39  ;;  %v2089_v43 = vmax.f32 %v2079_v35, %v727_v40 }
 0x197   : > { %v742_v44 = vsub.f32 %v2077_v34, %v2086_v42  ;;  %1336 = vst.msk [vmem:[#allocation2 + $0x30] sm:$0xff] %vm276_vm2, %v2086_v42  ;;  %792 = vperm.xlu1 %1744, %v2086_v42   ;;  %v743_v45 = vsub.f32 %v2079_v35, %v2089_v43  ;;  %1337 = vst.msk [vmem:[#allocation2 + $0x38] sm:$0xff] %vm276_vm2, %v2089_v43  ;;  %v826_v35 = vld [vmem:[#allocation3 + $0x10] sm:$0xff] }
 0x199   : > { %v756_v6 = vmul.f32 1.442695, %v742_v44 }
 0x19b   : > { %797 = vperm.xlu1 %1744, %v2089_v43  }
 0x1fe   : > { %v763_v60 = vpop.permute.xlu0 %762 }
 0x1ff   : > { %v800_v61 = vsub.f32 %v1975_v26, %v763_v60 }
 0x201   : > { %v808_v62 = vmul.f32 1.442695, %v800_v61 }
 0x202   : > { %v768_v63 = vpop.permute.xlu1 %767 }
 0x203   : > { %1745 = vpow2.f32 %v808_v62  ;;  %v801_v1 = vsub.f32 %v1977_v27, %v768_v63 }
 0x205   : > { %v810_v2 = vmul.f32 1.442695, %v801_v1 }
 0x206   : > { %v773_v3 = vpop.permute.xlu1 %772 }
 0x207   : > { %1747 = vpow2.f32 %v810_v2  ;;  %v802_v5 = vsub.f32 %v1983_v36, %v773_v3 }
 0x209   : > { %v812_v9 = vmul.f32 1.442695, %v802_v5 }
 0x20a   : > { %v778_v13 = vpop.permute.xlu1 %777 }
 0x20b   : > { %1749 = vpow2.f32 %v812_v9  ;;  %v803_v17 = vsub.f32 %v1985_v37, %v778_v13 }
 0x20d   : > { %v1746_v22 = vpop.eup %1745  ;;  %v814_v23 = vmul.f32 1.442695, %v803_v17  ;;  %v748_v17 = vmul.f32 1.442695, %v738_v16 }
 0x20e   : > { %v783_v24 = vpop.permute.xlu1 %782  ;;  %v840_v26 = vsel %vm703_vm3, %v1746_v22, 0.0  ;;  %v937_v25 = vpack.c.bf16 %v1746_v22, %v1746_v22  ;;  %v750_v22 = vmul.f32 1.442695, %v739_v21 }
 0x20f   : > { %1751 = vpow2.f32 %v814_v23  ;;  %v804_v32 = vsub.f32 %v1991_v46, %v783_v24  ;;  %841 = vadd.xlane.f32.xlu1 %v840_v26 }
 0x210   : > { %1670 = vmatmul.mubr.msk.bf16.vlgmr.msra.gmra.mrb[16].mxu0 %vm703_vm3, %v937_v25 }
 0x211   : > { %v1748_v27 = vpop.eup %1747  ;;  %v816_v33 = vmul.f32 1.442695, %v804_v32  ;;  %1680 = vmatpush3.bf16.msra.mxu0 %v1042_v41  ;;  %1681 = vmatprep.mubr.msk.bf16.mxu0 %vm1818_vm1, %v1817_v0  ;;  %v828_v32 = vld [vmem:[#allocation3 + $0x20] sm:$0xff] }
 0x212   : > { %v788_v36 = vpop.permute.xlu1 %787  ;;  %v843_v37 = vsel %vm703_vm3, %v1748_v27, 0.0  ;;  %v938_v38 = vpack.c.bf16 %v1748_v27, %v1748_v27  ;;  %1691 = vmatprep.subr.bf16.mxu0 %v1817_v0 }
 0x213   : > { %1753 = vpow2.f32 %v816_v33  ;;  %v805_v39 = vsub.f32 %v1993_v47, %v788_v36  ;;  %844 = vadd.xlane.f32.xlu0 %v843_v37 }
 0x214   : > { %1676 = vmatmul.mubr.msk.bf16.vlgmr.msra.gmra.mrb[16].mxu1 %vm703_vm3, %v938_v38  ;;  %v829_v38 = vld [vmem:[#allocation3 + $0x28] sm:$0xff] }
 0x215   : > { %v1750_v46 = vpop.eup %1749  ;;  %v818_v40 = vmul.f32 1.442695, %v805_v39  ;;  %1686 = vmatpush3.bf16.msra.mxu1 %v1088_v49  ;;  %1687 = vmatprep.mubr.msk.bf16.mxu1 %vm1818_vm1, %v1817_v0 }
 0x216   : > { %v793_v41 = vpop.permute.xlu1 %792  ;;  %v846_v48 = vsel %vm703_vm3, %v1750_v46, 0.0  ;;  %v939_v50 = vpack.c.bf16 %v1750_v46, %v1750_v46  ;;  %1697 = vmatprep.subr.bf16.mxu1 %v1817_v0 }
 0x217   : > { %1755 = vpow2.f32 %v818_v40  ;;  %v806_v52 = vsub.f32 %v1999_v57, %v793_v41  ;;  %847 = vadd.xlane.f32.xlu0 %v846_v48  ;;  %v830_v48 = vld [vmem:[#allocation3 + $0x30] sm:$0xff] }
 0x218   : > { %1682 = vmatmul.mubr.msk.bf16.vlgmr.msra.gmra.mrb[20].mxu0 %vm703_vm3, %v939_v50 }
 0x219   : > { %v1752_v47 = vpop.eup %1751  ;;  %v820_v54 = vmul.f32 1.442695, %v806_v52  ;;  %1692 = vmatpush3.bf16.msra.mxu0 %v1134_v51  ;;  %1693 = vmatprep.mubr.msk.bf16.mxu0 %vm1818_vm1, %v1817_v0 }
 0x21a   : > { %v798_v49 = vpop.permute.xlu1 %797  ;;  %v849_v56 = vsel %vm703_vm3, %v1752_v47, 0.0  ;;  %v940_v60 = vpack.c.bf16 %v1752_v47, %v1752_v47  ;;  %1703 = vmatprep.subr.bf16.mxu0 %v1817_v0 }
 0x21b   : > { %1757 = vpow2.f32 %v820_v54  ;;  %v807_v61 = vsub.f32 %v2001_v58, %v798_v49  ;;  %850 = vadd.xlane.f32.xlu1 %v849_v56  ;;  %v831_v56 = vld [vmem:[#allocation3 + $0x38] sm:$0xff] }
 0x21c   : > { %1688 = vmatmul.mubr.msk.bf16.vlgmr.msra.gmra.mrb[20].mxu1 %vm703_vm3, %v940_v60 }
 0x21d   : > { %v1754_v57 = vpop.eup %1753  ;;  %v822_v62 = vmul.f32 1.442695, %v807_v61  ;;  %1698 = vmatpush3.bf16.msra.mxu1 %v2107_v53  ;;  %1699 = vmatprep.mubr.msk.bf16.mxu1 %vm1818_vm1, %v1817_v0 }
 0x21e   : > { %v852_v51 = vsel %vm703_vm3, %v1754_v57, 0.0  ;;  %v941_v63 = vpack.c.bf16 %v1754_v57, %v1754_v57  ;;  %1709 = vmatprep.subr.bf16.mxu1 %v1817_v0 }
 0x21f   : > { %1759 = vpow2.f32 %v822_v62  ;;  %853 = vadd.xlane.f32.xlu0 %v852_v51 }
 0x220   : > { %1694 = vmatmul.mubr.msk.bf16.vlgmr.msra.gmra.mrb[24].mxu0 %vm703_vm3, %v941_v63 }
 0x221   : > { %v1756_v58 = vpop.eup %1755  ;;  %1704 = vmatpush3.bf16.msra.mxu0 %v2111_v55  ;;  %1705 = vmatprep.mubr.msk.bf16.mxu0 %vm1818_vm1, %v1817_v0 }
 0x222   : > { %v855_v53 = vsel %vm703_vm3, %v1756_v58, 0.0  ;;  %v942_v1 = vpack.c.bf16 %v1756_v58, %v1756_v58 }
 0x223   : > { %856 = vadd.xlane.f32.xlu1 %v855_v53 }
 0x224   : > { %1700 = vmatmul.mubr.msk.bf16.vlgmr.msra.gmra.mrb[24].mxu1 %vm703_vm3, %v942_v1 }
 0x225   : > { %v1758_v2 = vpop.eup %1757  ;;  %1710 = vmatpush3.bf16.msra.mxu1 %v2115_v59  ;;  %1711 = vmatprep.mubr.msk.bf16.mxu1 %vm1818_vm1, %v1817_v0  ;;  %v746_v59 = vmul.f32 1.442695, %v737_v12  ;;  %v744_v0 = vmul.f32 1.442695, %v736_v8  ;;  %v758_v8 = vmul.f32 1.442695, %v743_v45 }
 0x226   : > { %v858_v3 = vsel %vm703_vm3, %v1758_v2, 0.0  ;;  %v943_v5 = vpack.c.bf16 %v1758_v2, %v1758_v2  ;;  %v827_v45 = vld [vmem:[#allocation3 + $0x18] sm:$0xff] }
 0x227   : > { %859 = vadd.xlane.f32.xlu0 %v858_v3  ;;  %1761 = vpow2.f32 %v746_v59  ;;  %v881_v59 = vld [vmem:[#allocation4] sm:$0xff] }
 0x228   : > { %1706 = vmatmul.mubr.msk.bf16.vlgmr.msra.gmra.mrb[28].mxu0 %vm703_vm3, %v943_v5  ;;  %1763 = vpow2.f32 %v744_v0 }
 0x229   : > { %v1760_v55 = vpop.eup %1759  ;;  %1765 = vpow2.f32 %v748_v17 }
 0x22a   : > { %v861_v9 = vsel %vm703_vm3, %v1760_v55, 0.0  ;;  %v944_v13 = vpack.c.bf16 %v1760_v55, %v1760_v55  ;;  %1767 = vpow2.f32 %v750_v22 }
 0x22b   : > { %862 = vadd.xlane.f32.xlu1 %v861_v9  ;;  %1769 = vpow2.f32 %v752_v7  ;;  %v882_v7 = vld [vmem:[#allocation4 + $0x8] sm:$0xff] }
 0x22c   : > { %1712 = vmatmul.mubr.msk.bf16.vlgmr.msra.gmra.mrb[28].mxu1 %vm703_vm3, %v944_v13  ;;  %1771 = vpow2.f32 %v754_v4 }
 0x22d   : > { %1773 = vpow2.f32 %v756_v6 }
 0x22e   : > { %1775 = vpow2.f32 %v758_v8 }
 0x231   : > { %v1762_v10 = vpop.eup %1761 }
 0x232   : > { %v1764_v11 = vpop.eup %1763  ;;  %v833_v31 = vmul.f32 %v1762_v10, %v825_v29  ;;  %v884_v29 = vld [vmem:[#allocation4 + $0x18] sm:$0xff] }
 0x233   : > { %v1766_v12 = vpop.eup %1765  ;;  %v832_v21 = vmul.f32 %v1764_v11, %v824_v20 }
 0x234   : > { %v1768_v14 = vpop.eup %1767  ;;  %v834_v43 = vmul.f32 %v1766_v12, %v826_v35 }
 0x235   : > { %v1770_v15 = vpop.eup %1769  ;;  %v835_v26 = vmul.f32 %v1768_v14, %v827_v45  ;;  %v885_v45 = vld [vmem:[#allocation4 + $0x20] sm:$0xff] }
 0x236   : > { %v1772_v16 = vpop.eup %1771  ;;  %v836_v36 = vmul.f32 %v1770_v15, %v828_v32 }
 0x237   : > { %v1774_v18 = vpop.eup %1773  ;;  %v837_v40 = vmul.f32 %v1772_v16, %v829_v38 }
 0x238   : > { %v1776_v19 = vpop.eup %1775  ;;  %v838_v54 = vmul.f32 %v1774_v18, %v830_v48 }
 0x239   : > { %v839_v62 = vmul.f32 %v1776_v19, %v831_v56 }
 0x23c   : > { %896 = vperm.xlu1 %1744, %v1762_v10  }
 0x23d   : > { %891 = vperm.xlu0 %1743, %v1764_v11  }
 0x240   : > { %901 = vperm.xlu1 %1744, %v1766_v12  }
 0x241   : > { %906 = vperm.xlu0 %1743, %v1768_v14   ;;  %v883_v14 = vld [vmem:[#allocation4 + $0x10] sm:$0xff] }
 0x244   : > { %911 = vperm.xlu1 %1744, %v1770_v15  }
 0x245   : > { %916 = vperm.xlu0 %1743, %v1772_v16  }
 0x248   : > { %921 = vperm.xlu1 %1744, %v1774_v18  }
 0x249   : > { %926 = vperm.xlu0 %1743, %v1776_v19  }
 0x29c   : > { %v842_v28 = vpop.xlane.xlu1 %841 }
 0x29d   : > { %v864_v30 = vadd.f32 %v842_v28, %v832_v21 }
 0x29f   : > { %873 = vst.msk [vmem:[#allocation3] sm:$0xff] %vm276_vm2, %v864_v30 }
 0x2a0   : > { %v845_v34 = vpop.xlane.xlu0 %844 }
 0x2a1   : > { %v865_v42 = vadd.f32 %v845_v34, %v833_v31 }
 0x2a3   : > { %874 = vst.msk [vmem:[#allocation3 + $0x8] sm:$0xff] %vm276_vm2, %v865_v42 }
 0x2a4   : > { %v848_v44 = vpop.xlane.xlu0 %847 }
 0x2a5   : > { %v866_v23 = vadd.f32 %v848_v44, %v834_v43 }
 0x2a6   : > { %v1349_v24 = vld [vmem:[#allocation3] sm:$0xff] }
 0x2a7   : > { %875 = vst.msk [vmem:[#allocation3 + $0x10] sm:$0xff] %vm276_vm2, %v866_v23  ;;  %1777 = vrcp.f32 %v1349_v24 }
 0x2a8   : > { %v851_v25 = vpop.xlane.xlu1 %850 }
 0x2a9   : > { %v867_v27 = vadd.f32 %v851_v25, %v835_v26 }
 0x2aa   : > { %v1350_v33 = vld [vmem:[#allocation3 + $0x8] sm:$0xff] }
 0x2ab   : > { %876 = vst.msk [vmem:[#allocation3 + $0x18] sm:$0xff] %vm276_vm2, %v867_v27  ;;  %1779 = vrcp.f32 %v1350_v33 }
 0x2ac   : > { %v854_v37 = vpop.xlane.xlu0 %853 }
 0x2ad   : > { %v868_v39 = vadd.f32 %v854_v37, %v836_v36  ;;  %v886_v36 = vld [vmem:[#allocation4 + $0x28] sm:$0xff] }
 0x2ae   : > { %v1351_v46 = vld [vmem:[#allocation3 + $0x10] sm:$0xff] }
 0x2af   : > { %877 = vst.msk [vmem:[#allocation3 + $0x20] sm:$0xff] %vm276_vm2, %v868_v39  ;;  %1781 = vrcp.f32 %v1351_v46 }
 0x2b0   : > { %v857_v41 = vpop.xlane.xlu1 %856 }
 0x2b1   : > { %v1778_v50 = vpop.eup %1777  ;;  %v869_v52 = vadd.f32 %v857_v41, %v837_v40 }
 0x2b2   : > { %1367 = vperm.xlu1 %1744, %v1778_v50   ;;  %v1352_v47 = vld [vmem:[#allocation3 + $0x18] sm:$0xff]  ;;  %v887_v50 = vld [vmem:[#allocation4 + $0x30] sm:$0xff] }
 0x2b3   : > { %878 = vst.msk [vmem:[#allocation3 + $0x28] sm:$0xff] %vm276_vm2, %v869_v52  ;;  %1783 = vrcp.f32 %v1352_v47 }
 0x2b4   : > { %v860_v49 = vpop.xlane.xlu0 %859 }
 0x2b5   : > { %v1780_v60 = vpop.eup %1779  ;;  %v870_v61 = vadd.f32 %v860_v49, %v838_v54 }
 0x2b6   : > { %1372 = vperm.xlu0 %1743, %v1780_v60   ;;  %v1353_v57 = vld [vmem:[#allocation3 + $0x20] sm:$0xff] }
 0x2b7   : > { %879 = vst.msk [vmem:[#allocation3 + $0x30] sm:$0xff] %vm276_vm2, %v870_v61  ;;  %1785 = vrcp.f32 %v1353_v57  ;;  %v888_v57 = vld [vmem:[#allocation4 + $0x38] sm:$0xff] }
 0x2b8   : > { %v863_v51 = vpop.xlane.xlu1 %862 }
 0x2b9   : > { %v1782_v63 = vpop.eup %1781  ;;  %v871_v58 = vadd.f32 %v863_v51, %v839_v62 }
 0x2ba   : > { %1377 = vperm.xlu1 %1744, %v1782_v63   ;;  %v1354_v53 = vld [vmem:[#allocation3 + $0x28] sm:$0xff] }
 0x2bb   : > { %880 = vst.msk [vmem:[#allocation3 + $0x38] sm:$0xff] %vm276_vm2, %v871_v58  ;;  %1787 = vrcp.f32 %v1354_v53 }
 0x2bc   : > { %v892_v0 = vpop.permute.xlu0 %891  ;;  %v897_v17 = vpop.permute.xlu1 %896 }
 0x2bd   : > { %v1784_v1 = vpop.eup %1783  ;;  %v929_v22 = vmul.f32 %v892_v0, %v881_v59  ;;  %v930_v11 = vmul.f32 %v897_v17, %v882_v7 }
 0x2be   : > { %1382 = vperm.xlu0 %1743, %v1784_v1   ;;  %v1355_v2 = vld [vmem:[#allocation3 + $0x30] sm:$0xff] }
 0x2bf   : > { %1789 = vrcp.f32 %v1355_v2 }
 0x2c0   : > { %v902_v15 = vpop.permute.xlu1 %901  ;;  %v907_v30 = vpop.permute.xlu0 %906 }
 0x2c1   : > { %v1786_v3 = vpop.eup %1785  ;;  %v931_v21 = vmul.f32 %v902_v15, %v883_v14  ;;  %v932_v43 = vmul.f32 %v907_v30, %v884_v29 }
 0x2c2   : > { %1387 = vperm.xlu1 %1744, %v1786_v3   ;;  %v1356_v5 = vld [vmem:[#allocation3 + $0x38] sm:$0xff] }
 0x2c3   : > { %1791 = vrcp.f32 %v1356_v5 }
 0x2c4   : > { %v912_v23 = vpop.permute.xlu1 %911  ;;  %v917_v37 = vpop.permute.xlu0 %916 }
 0x2c5   : > { %v1788_v55 = vpop.eup %1787  ;;  %v933_v27 = vmul.f32 %v912_v23, %v885_v45  ;;  %v934_v41 = vmul.f32 %v917_v37, %v886_v36 }
 0x2c6   : > { %1392 = vperm.xlu0 %1743, %v1788_v55  }
 0x2c8   : > { %v922_v52 = vpop.permute.xlu1 %921  ;;  %v927_v62 = vpop.permute.xlu0 %926 }
 0x2c9   : > { %v1790_v9 = vpop.eup %1789  ;;  %v935_v60 = vmul.f32 %v922_v52, %v887_v50  ;;  %v936_v1 = vmul.f32 %v927_v62, %v888_v57 }
 0x2ca   : > { %1397 = vperm.xlu1 %1744, %v1790_v9  }
 0x2cd   : > { %v1792_v13 = vpop.eup %1791 }
 0x2ce   : > { %1402 = vperm.xlu0 %1743, %v1792_v13  }
 0x2e3   : > { %v986_v4 = vpop.f32.mrb[16].mxu0 }
 0x2e4   : > { %v1314_v6 = vadd.f32 %v986_v4, %v929_v22  ;;  %v1671_v8 = vpop.f32.mrb[17].mxu0 }
 0x2e5   : > { %v989_v10 = vpop.f32.mrb[18].mxu0 }
 0x2e6   : > { %1322 = vst.msk [vmem:[#allocation4] sm:$0xff] %vm293_vm0, %v1314_v6  ;;  %v1672_v12 = vpop.f32.mrb[19].mxu0 }
 0x2e7   : > { %v1032_v16 = vpop.f32.mrb[16].mxu1 }
 0x2e8   : > { %v1315_v18 = vadd.f32 %v1032_v16, %v930_v11  ;;  %v1677_v19 = vpop.f32.mrb[17].mxu1 }
 0x2e9   : > { %v1035_v20 = vpop.f32.mrb[18].mxu1 }
 0x2ea   : > { %1323 = vst.msk [vmem:[#allocation4 + $0x8] sm:$0xff] %vm293_vm0, %v1315_v18  ;;  %v1678_v28 = vpop.f32.mrb[19].mxu1 }
 0x2eb   : > { %v1078_v31 = vpop.f32.mrb[20].mxu0 }
 0x2ec   : > { %v1316_v34 = vadd.f32 %v1078_v31, %v931_v21  ;;  %v1683_v35 = vpop.f32.mrb[21].mxu0 }
 0x2ed   : > { %v1081_v42 = vpop.f32.mrb[22].mxu0  ;;  %v1341_v0 = vld [vmem:[#allocation4] sm:$0xff] }
 0x2ee   : > { %1324 = vst.msk [vmem:[#allocation4 + $0x10] sm:$0xff] %vm293_vm0, %v1316_v34  ;;  %v1684_v44 = vpop.f32.mrb[23].mxu0 }
 0x2ef   : > { %v1124_v24 = vpop.f32.mrb[20].mxu1 }
 0x2f0   : > { %v1317_v26 = vadd.f32 %v1124_v24, %v932_v43  ;;  %v1689_v25 = vpop.f32.mrb[21].mxu1 }
 0x2f1   : > { %v1127_v32 = vpop.f32.mrb[22].mxu1  ;;  %v1342_v7 = vld [vmem:[#allocation4 + $0x8] sm:$0xff] }
 0x2f2   : > { %1325 = vst.msk [vmem:[#allocation4 + $0x18] sm:$0xff] %vm293_vm0, %v1317_v26  ;;  %v1690_v33 = vpop.f32.mrb[23].mxu1 }
 0x2f3   : > { %v1170_v38 = vpop.f32.mrb[24].mxu0 }
 0x2f4   : > { %v1318_v39 = vadd.f32 %v1170_v38, %v933_v27  ;;  %v1695_v46 = vpop.f32.mrb[25].mxu0 }
 0x2f5   : > { %v1173_v40 = vpop.f32.mrb[26].mxu0  ;;  %v1343_v11 = vld [vmem:[#allocation4 + $0x10] sm:$0xff] }
 0x2f6   : > { %1326 = vst.msk [vmem:[#allocation4 + $0x20] sm:$0xff] %vm293_vm0, %v1318_v39  ;;  %v1696_v48 = vpop.f32.mrb[27].mxu0 }
 0x2f7   : > { %v1216_v47 = vpop.f32.mrb[24].mxu1 }
 0x2f8   : > { %v1319_v54 = vadd.f32 %v1216_v47, %v934_v41  ;;  %v1701_v49 = vpop.f32.mrb[25].mxu1 }
 0x2f9   : > { %v1219_v56 = vpop.f32.mrb[26].mxu1  ;;  %v1344_v15 = vld [vmem:[#allocation4 + $0x18] sm:$0xff] }
 0x2fa   : > { %1327 = vst.msk [vmem:[#allocation4 + $0x28] sm:$0xff] %vm293_vm0, %v1319_v54  ;;  %v1702_v61 = vpop.f32.mrb[27].mxu1 }
 0x2fb   : > { %v1262_v51 = vpop.f32.mrb[28].mxu0 }
 0x2fc   : > { %v1320_v63 = vadd.f32 %v1262_v51, %v935_v60  ;;  %v1707_v58 = vpop.f32.mrb[29].mxu0 }
 0x2fd   : > { %v1265_v53 = vpop.f32.mrb[30].mxu0  ;;  %v1345_v21 = vld [vmem:[#allocation4 + $0x20] sm:$0xff] }
 0x2fe   : > { %1328 = vst.msk [vmem:[#allocation4 + $0x30] sm:$0xff] %vm293_vm0, %v1320_v63  ;;  %v1708_v2 = vpop.f32.mrb[31].mxu0 }
 0x2ff   : > { %v1308_v3 = vpop.f32.mrb[28].mxu1 }
 0x300   : > { %v1321_v5 = vadd.f32 %v1308_v3, %v936_v1  ;;  %v1713_v55 = vpop.f32.mrb[29].mxu1 }
 0x301   : > { %v1311_v9 = vpop.f32.mrb[30].mxu1  ;;  %v1346_v30 = vld [vmem:[#allocation4 + $0x28] sm:$0xff] }
 0x302   : > { %1329 = vst.msk [vmem:[#allocation4 + $0x38] sm:$0xff] %vm293_vm0, %v1321_v5  ;;  %v1714_v13 = vpop.f32.mrb[31].mxu1 }
 0x305   : > { %v1347_v43 = vld [vmem:[#allocation4 + $0x30] sm:$0xff] }
 0x309   : > { %v1348_v23 = vld [vmem:[#allocation4 + $0x38] sm:$0xff] }
 0x331   : > { %v1368_v59 = vpop.permute.xlu1 %1367 }
 0x332   : > { %v1405_v17 = vmul.f32 %v1368_v59, %v1341_v0 }
 0x334   : > { %v1413_v22 = vpack.c.bf16 %v1405_v17, %v1405_v17 }
 0x335   : > { %v1373_v4 = vpop.permute.xlu0 %1372 }
 0x336   : > { %1422 = vst.msk [vmem:[%s2204_s28] sm:$0xf] %vm1421_vm5, %v1413_v22  ;;  %v1406_v6 = vmul.f32 %v1373_v4, %v1342_v7 }
 0x338   : > { %v1414_v8 = vpack.c.bf16 %v1406_v6, %v1406_v6 }
 0x339   : > { %v1378_v10 = vpop.permute.xlu1 %1377 }
 0x33a   : > { %1423 = vst.msk [vmem:[%s2204_s28 + $0x4] sm:$0xf] %vm1421_vm5, %v1414_v8  ;;  %v1407_v12 = vmul.f32 %v1378_v10, %v1343_v11 }
 0x33c   : > { %v1415_v14 = vpack.c.bf16 %v1407_v12, %v1407_v12 }
 0x33d   : > { %v1383_v16 = vpop.permute.xlu0 %1382 }
 0x33e   : > { %1424 = vst.msk [vmem:[%s2204_s28 + $0x8] sm:$0xf] %vm1421_vm5, %v1415_v14  ;;  %v1408_v18 = vmul.f32 %v1383_v16, %v1344_v15 }
 0x340   : > { %v1416_v19 = vpack.c.bf16 %v1408_v18, %v1408_v18 }
 0x341   : > { %v1388_v20 = vpop.permute.xlu1 %1387 }
 0x342   : > { %1425 = vst.msk [vmem:[%s2204_s28 + $0xc] sm:$0xf] %vm1421_vm5, %v1416_v19  ;;  %v1409_v28 = vmul.f32 %v1388_v20, %v1345_v21 }
 0x344   : > { %v1417_v29 = vpack.c.bf16 %v1409_v28, %v1409_v28 }
 0x345   : > { %v1393_v31 = vpop.permute.xlu0 %1392 }
 0x346   : > { %1426 = vst.msk [vmem:[%s2204_s28 + $0x10] sm:$0xf] %vm1421_vm5, %v1417_v29  ;;  %v1410_v34 = vmul.f32 %v1393_v31, %v1346_v30 }
 0x348   : > { %v1418_v35 = vpack.c.bf16 %v1410_v34, %v1410_v34 }
 0x349   : > { %v1398_v42 = vpop.permute.xlu1 %1397 }
 0x34a   : > { %1427 = vst.msk [vmem:[%s2204_s28 + $0x14] sm:$0xf] %vm1421_vm5, %v1418_v35  ;;  %v1411_v44 = vmul.f32 %v1398_v42, %v1347_v43 }
 0x34c   : > { %v1419_v45 = vpack.c.bf16 %v1411_v44, %v1411_v44 }
 0x34d   : > { %v1403_v24 = vpop.permute.xlu0 %1402 }
 0x34e   : > { %1428 = vst.msk [vmem:[%s2204_s28 + $0x18] sm:$0xf] %vm1421_vm5, %v1419_v45  ;;  %v1412_v26 = vmul.f32 %v1403_v24, %v1348_v23 }
 0x350   : > { %v1420_v25 = vpack.c.bf16 %v1412_v26, %v1412_v26 }
 0x352   : > { %1429 = vst.msk [vmem:[%s2204_s28 + $0x1c] sm:$0xf] %vm1421_vm5, %v1420_v25 }
 0x353 PF: > { %s13_s14 = sadd.s32 1, %s1815_s14   ;;  %s2235_s12 = smov %s1811_s13 }
 0x354   : > { %p10_p5 = scmp.ge.s32.totalorder %s13_s14, 4   ;;  %s2236_s13 = smov %s2238_s15 }
 0x356   :  { %12 = sbr.rel (!%p10_p5) target bundleno = 2 (0x2), region = 76 }

// kernel: multi_head_cross_attention.7
= control target key start
LH: loop header
LB: loop body
LE: loop exit
PB: predicated region body
PF: predicated region fallthrough
CT: control target
= control target key end

     0   :  { %v157_v1 = vmov 0.0   ;;  %vm158_vm0 = vmmov 0   ;;  %s206_s0 = inlined_call_operand.vmem [shape: bf16[16,32], index: 0, kind: input, shape index: {}]   ;;  %s207_s1 = inlined_call_operand.vmem [shape: bf16[32,32], index: 1, kind: input, shape index: {}]   ;;  %s208_s2 = inlined_call_operand.vmem [shape: f32[1,32], index: 2, kind: input, shape index: {}]   ;;  %s209_s3 = inlined_call_operand.hbm [shape: f32[16,32], index: 3, kind: output, shape index: {}]  }
   0x1   :  { %v130_v0 = vld [vmem:[%s207_s1] sm:$0xff]   ;;  %117 = vmatprep.subr.bf16.mxu0 %v157_v1  ;;  %v131_v2 = vld [vmem:[%s207_s1 + $0x8] sm:$0xff]   ;;  %121 = vmatprep.mubr.msk.bf16.mxu0 %vm158_vm0, %v157_v1 }
   0x2   :  { %118 = vmatpush3.bf16.msra.mxu0 %v130_v0 }
   0x3   :  { %119 = vmatprep.subr.bf16.mxu0 %v157_v1 }
   0x4   :  { %8 = vsyncpa [#allocation3], 0  ;;  %v132_v3 = vld [vmem:[%s206_s0] sm:$0xff]   ;;  %vm46_vm1 = vcmask 261120   ;;  %s159_s20 = smov [#allocation2]  }
   0x5   :  { %v109_v4 = vld [vmem:[%s208_s2] ss:$0 sm:$0xff]  ;;  %s98_s21 = sshll.u32 %s159_s20, 4  ;;  %s99_s21 = int_to_ptr.vmem [resolvable:$true] %s98_s21 }
   0x6   :  { %120 = vmatpush3.bf16.msra.mxu0 %v131_v2  ;;  %s133_s1 = scalar_lea.vmem %s99_s21, 256  ;;  %p138_p1 = scmp.lt.s32.totalorder %s99_s21, %s99_s21 }
   0x7   :  { %p134_p0 = scmp.ne.s32.totalorder %s99_s21, %s133_s1  ;;  %p139_p2 = scmp.lt.s32.totalorder %s133_s1, %s133_s1 }
   0x9   :  { %122 = vmatmul.mubr.msk.bf16.vlgmr.msra.gmra.mrb[0].mxu0 %vm46_vm1, %v132_v3  ;;  %p140_p3 = por %p139_p2, %p138_p1 }
   0xb   :  { %p141_p4 = pnand %p140_p3, %p134_p0 }
  0xdc   :  { %v84_v5 = vpop.f32.mrb[0].mxu0 }
  0xdd   :  { %v85_v6 = vadd.f32 %v109_v4, %v84_v5  ;;  %v123_v7 = vpop.f32.mrb[1].mxu0 }
  0xde   :  { %v87_v8 = vpop.f32.mrb[2].mxu0 }
  0xdf   :  { %91 = vst.msk [vmem:[#allocation2] sm:$0xff] %vm46_vm1, %v85_v6  ;;  %v88_v9 = vadd.f32 %v109_v4, %v87_v8  ;;  %v124_v10 = vpop.f32.mrb[3].mxu0 }
  0xe1   :  { %92 = vst.msk [vmem:[#allocation2 + $0x8] sm:$0xff] %vm46_vm1, %v88_v9 }
  0xe2   :  { %144 = shalt.err (!%p141_p4)
}
  0xe3   :  { %s145_s22 = scalar_lea.hbm %s209_s3, 256 }
  0xe4   :  { %p146_p5 = scmp.ne.s32.totalorder %s209_s3, %s145_s22  ;;  %p149_p6 = scmp.lt.u32.totalorder %s145_s22, %s209_s3 }
  0xe6   :  { %p151_p7 = pnand %p149_p6, %p146_p5 }
  0xe8   :  { %154 = shalt.err (!%p151_p7)
}
  0xe9   :  { %s160_s27 = smov 128   ;;  %s161_s28 = smov 8  }
  0xea   :  { %104 = dma.vmem_to_hbm [thread:$0]  %s99_s21, 256, %s209_s3, [#allocation3], %s160_s27, %s160_s27, %s161_s28  }
  0xeb   :  { %155 = dma.done.wait [#allocation3], 256  }
  0xec   :  { %156 = vsyncadd [#allocation3], 4294967040 }
  0xed   :  { %108 = vsyncpa [#allocation3], 1 }

</bundles_post_ra>
